<compile_context>
chip_gen: v6e
topology: v6e:2x2x1
jax: 0.10.0
libtpu: 0.0.40
codegen_flags: <defaults>
</compile_context>

<pallas_src>
import numpy as np
from functools import partial

import jax
import jax.numpy as jnp
from jax import lax
from jax.experimental import pallas as pl
from jax.experimental.pallas import tpu as pltpu


_VMEM_LIMIT_BYTES = 64 * 1024 * 1024   # <= physical VMEM on v5e/v6e (128 MiB) and v7x (64 MiB)
_VMEM_WORK_BUDGET = 40 * 1024 * 1024   # conservative per-step planning budget (headroom)
_MAX_TILE_NC = 8                       # cap keeps the lane-stacking concat / trace small


def _round_up(x, m):
    return ((x + m - 1) // m) * m


def _gaussian_1d(window_size, sigma):
    coords = np.arange(window_size, dtype=np.float64) - window_size // 2
    g = np.exp(-(coords ** 2) / (2.0 * float(sigma) ** 2))
    return g / g.sum()


def _make_banded_filters(H_pad, H, W, window_size, sigma):
    """Banded matrices: separable valid Gaussian conv == two MXU matmuls.

    row pass : data(H_pad, W)        @ G_row(W, OW_pad)    -> (H_pad, OW_pad)
    col pass : G_col(OH_pad, H_pad)  @ data(H_pad, OW_pad) -> (OH_pad, OW_pad)
    Columns >= OW / rows >= OH are exactly zero, so padded positions of the
    filtered maps are exact zeros (no reduction mask needed).
    """
    ws = int(window_size)
    g = _gaussian_1d(ws, sigma)
    OH, OW = H - ws + 1, W - ws + 1
    OH_pad, OW_pad = _round_up(OH, 8), _round_up(OW, 128)
    G_row = np.zeros((W, OW_pad), dtype=np.float32)
    for c in range(OW):
        G_row[c:c + ws, c] = g
    G_col = np.zeros((OH_pad, H_pad), dtype=np.float32)
    for r in range(OH):
        G_col[r, r:r + ws] = g
    return G_row, G_col, OH, OW, OH_pad, OW_pad


def _pick_tile_nc(NC, Hp, W, OHp, OWp):
    """Planes per grid step: biggest tile that fits a conservative VMEM model."""
    per_plane = 4 * (Hp * W * 17         # inputs (2x2 buffers) + products + stack + grads
                     + Hp * OWp * 10     # row-pass output + lane-stacked copy
                     + OHp * OWp * 11)   # filtered maps + SSIM temporaries
    const_bytes = 4 * (W * OWp + OHp * Hp)
    avail = _VMEM_WORK_BUDGET - const_bytes
    fit = max(1, avail // per_plane) if avail > 0 else 1
    return int(max(1, min(NC, _MAX_TILE_NC, fit)))


def _sum_all(a):
    """Reduce a rank-2 or rank-3 array to a (1, 1) value (lanes first)."""
    s = jnp.sum(a, axis=-1, keepdims=True)
    s = jnp.sum(s, axis=-2, keepdims=True)
    if s.ndim == 3:
        s = jnp.sum(s, axis=0)
    return s


def _make_kernel(T, H, W, Hp, OWp, C1, C2):
    def kernel(sr_ref, hr_ref, grow_ref, gcol_ref, out_ref):
        # native-dtype DMA, f32 compute
        x3 = sr_ref[...].astype(jnp.float32)      # (T, Hp, W)
        y3 = hr_ref[...].astype(jnp.float32)
        g_row = grow_ref[...]                     # (W, OWp)
        g_col = gcol_ref[...]                     # (OHp, Hp)

        # Hp % 8 == 0 -> tile-aligned (no relayout) collapse of the plane axis
        x = x3.reshape(T * Hp, W)
        y = y3.reshape(T * Hp, W)

        # ---------------- SSIM: separable Gaussian filter on the MXU ----------------
        # Row pass: ONE matmul over all 5 maps x T planes (batched along M).
        stacked = jnp.concatenate([x, y, x * x, y * y, x * y], axis=0)        # (5*T*Hp, W)
        t = jnp.dot(stacked, g_row, preferred_element_type=jnp.float32)       # (5*T*Hp, OWp)
        # Move the (map, plane) batch from sublanes to lanes with aligned slices
        # (Hp % 8 == 0, OWp % 128 == 0) so the column pass is a single fused matmul.
        t_lanes = jnp.concatenate(
            [t[s * Hp:(s + 1) * Hp, :] for s in range(5 * T)], axis=1)        # (Hp, 5*T*OWp)
        f = jnp.dot(g_col, t_lanes, preferred_element_type=jnp.float32)       # (OHp, 5*T*OWp)

        seg = T * OWp
        mu1 = f[:, 0 * seg:1 * seg]
        mu2 = f[:, 1 * seg:2 * seg]
        ex2 = f[:, 2 * seg:3 * seg]
        ey2 = f[:, 3 * seg:4 * seg]
        exy = f[:, 4 * seg:5 * seg]
        mu1_sq = mu1 * mu1
        mu2_sq = mu2 * mu2
        mu12 = mu1 * mu2
        sigma1_sq = ex2 - mu1_sq
        sigma2_sq = ey2 - mu2_sq
        sigma12 = exy - mu12
        num = (2.0 * mu12 + C1) * (2.0 * sigma12 + C2)
        den = (mu1_sq + mu2_sq + C1) * (sigma1_sq + sigma2_sq + C2)
        # Padded rows/cols/planes: all five filtered maps are exactly 0, hence
        # num == den == C1*C2 and (num/den - 1) == 0 exactly -> no mask needed.
        ssim_sum = _sum_all(num / den - 1.0)                                   # (1, 1)

        # ---------------- Range loss: sum |x - clamp(x, 0, 1)| ----------------
        # TODO(synk): RangeLoss source not provided; assuming the standard
        # out-of-[0,1]-range L1 penalty (znorm=False).
        range_sum = _sum_all(jnp.maximum(x - 1.0, 0.0) + jnp.maximum(-x, 0.0))

        # ---------------- Gradient ('2d') L1 loss ----------------
        # (x[1:]-x[:-1]) - (y[1:]-y[:-1]) == diff of d = x - y; the zeroed last
        # row/col of get_image_gradients only pad the mean denominator (wrapper).
        d3 = x3 - y3
        dcol = d3[:, :, 1:] - d3[:, :, :-1]       # (T, Hp, W-1); padded rows/planes are 0
        drow = d3[:, 1:, :] - d3[:, :-1, :]       # (T, Hp-1, W)
        if Hp > H:
            rows = lax.broadcasted_iota(jnp.int32, (T, Hp - 1, W), 1)
            drow = jnp.where(rows < H - 1, drow, 0.0)
        grad_sum = _sum_all(jnp.abs(dcol)) + _sum_all(jnp.abs(drow))           # (1, 1)

        # one lane-dense partial-sum block per step (ssim-1, range, grad)
        vals = jnp.concatenate([ssim_sum, range_sum, grad_sum], axis=0)        # (3, 1)
        out_ref[0] = jnp.broadcast_to(vals, (3, 128))

    return kernel


@partial(jax.jit, static_argnames=("window_size", "window_sigma", "data_range"))
def precise_losses_pallas(sr, hr, *, window_size=11, window_sigma=1.5, data_range=1.0):
    """Fused kernel: returns (ssim_value, range_loss, grad_loss) as f32 scalars."""
    assert sr.shape == hr.shape
    N, C, H, W = sr.shape
    ws = int(window_size)
    assert H >= ws and W >= ws, "spatial dims must be >= SSIM window size"

    NC = N * C
    Hp = _round_up(H, 8)                       # sublane-aligned plane height
    G_row, G_col, OH, OW, OHp, OWp = _make_banded_filters(Hp, H, W, ws, window_sigma)
    T = _pick_tile_nc(NC, Hp, W, OHp, OWp)     # planes per grid step
    NC_pad = _round_up(NC, T)
    num_tiles = NC_pad // T

    K1, K2 = 0.01, 0.03
    C1 = float((K1 * data_range) ** 2)
    C2 = float((K2 * data_range) ** 2)
    kernel = _make_kernel(T, H, W, Hp, OWp, C1, C2)

    # Keep the native dtype across the HBM->VMEM DMA; upcast inside the kernel.
    sr3 = sr.reshape(NC, H, W)
    hr3 = hr.reshape(NC, H, W)
    if NC_pad != NC or Hp != H:
        pad = ((0, NC_pad - NC), (0, Hp - H), (0, 0))
        sr3 = jnp.pad(sr3, pad)                # zero planes/rows contribute exactly
        hr3 = jnp.pad(hr3, pad)                # 0 (grad/range) or ssim-1 == 0

    plane_spec = pl.BlockSpec((T, Hp, W), lambda i: (i, 0, 0))
    const_spec = lambda shape: pl.BlockSpec(   # constant filters: single-buffered
        shape, lambda i: (0, 0), pipeline_mode=pl.Buffered(1))

    partials = pl.pallas_call(
        kernel,
        out_shape=jax.ShapeDtypeStruct((num_tiles, 3, 128), jnp.float32),
        grid=(num_tiles,),
        in_specs=[plane_spec, plane_spec,
                  const_spec((W, OWp)), const_spec((OHp, Hp))],
        out_specs=pl.BlockSpec((1, 3, 128), lambda i: (i, 0, 0)),
        compiler_params=pltpu.CompilerParams(
            dimension_semantics=("parallel",),
            vmem_limit_bytes=_VMEM_LIMIT_BYTES),
    )(sr3, hr3, jnp.asarray(G_row), jnp.asarray(G_col))

    inv_map = 1.0 / float(NC * OH * OW)        # SSIM valid-map mean denominator
    inv_px = 1.0 / float(NC * H * W)           # grad / range mean denominator
    ssim_val = 1.0 + jnp.sum(partials[:, 0, 0]) * inv_map   # kernel summed (ssim - 1)
    range_val = jnp.sum(partials[:, 1, 0]) * inv_px
    grad_val = 0.5 * jnp.sum(partials[:, 2, 0]) * inv_px
    return ssim_val, range_val, grad_val


class PreciseGeneratorLossPallas:
    """JAX/Pallas port of PreciseGeneratorLoss.forward for the configured losses."""

    def __init__(self, opt):
        train_opt = opt['train']
        self.ssim_opts = dict(window_size=11, window_sigma=1.5, data_range=1.0)
        self.loss_list = []
        grad_w = train_opt.get('grad_weight', 0)
        grad_t = train_opt.get('grad_type', None)
        if grad_w > 0 and grad_t:
            self.loss_list.append({'name': grad_t, 'weight': float(grad_w), 'kind': 'grad'})
        ssim_w = train_opt.get('ssim_weight', 0)
        ssim_t = train_opt.get('ssim_type', None)
        if ssim_w > 0 and ssim_t:
            self.loss_list.append({'name': ssim_t, 'weight': float(ssim_w), 'kind': 'ssim'})
        # TODO(synk): fft loss (torch.fft) and fdpl loss (DCT + dataset means file)
        # have no clean in-kernel Pallas equivalent here and are not configured.
        range_w = train_opt.get('range_weight', 0)
        if range_w > 0:
            # znorm assumed False -> legit_range = [0, 1]
            self.loss_list.append({'name': 'range', 'weight': float(range_w), 'kind': 'range'})

    def forward(self, sr, hr, log_dict, fsfilter=None, selector=None):
        # mirror the dtype promotion / assertions of the PyTorch module
        if sr.dtype in (jnp.float16, jnp.int8, jnp.int32):
            sr = sr.astype(jnp.float32)
        if hr.dtype in (jnp.float16, jnp.int8, jnp.int32):
            hr = hr.astype(jnp.float32)
        assert sr.dtype == hr.dtype, (
            f'Error: SR and HR have different precision in precise losses: {sr.dtype} and {hr.dtype}')

        # single fused kernel computes the raw loss values (native dtype across DMA)
        ssim_val, range_val, grad_val = precise_losses_pallas(sr, hr, **self.ssim_opts)

        loss_results = []
        for l in self.loss_list:
            if l['kind'] == 'ssim':
                effective_loss = l['weight'] * (1.0 - ssim_val)
            elif l['kind'] == 'range':
                effective_loss = l['weight'] * range_val   # function(sr) only
            else:  # grad
                effective_loss = l['weight'] * grad_val
            loss_results.append(effective_loss)

        # single device sync for all logged scalars (no per-loss .item() stalls)
        host_vals = jax.device_get(loss_results)
        for l, v in zip(self.loss_list, host_vals):
            log_dict[l['name']] = float(v)
        return loss_results, log_dict


if __name__ == "__main__":
    opt = {
        'train': {
            'grad_weight': 1.0, 'grad_type': 'grad-2d-l1',
            'ssim_weight': 1.0, 'ssim_type': 'ssim',
            'range_weight': 1.0,
            'image_channels': 3,
        }
    }
    module = PreciseGeneratorLossPallas(opt)

    key = jax.random.PRNGKey(0)
    k1, k2 = jax.random.split(key)
    # small shapes: batch=2, channels=3 (image), spatial=16x16
    sr = jax.random.uniform(k1, (2, 3, 16, 16), dtype=jnp.float32, minval=-0.1, maxval=1.1)
    hr = jax.random.uniform(k2, (2, 3, 16, 16), dtype=jnp.float32, minval=0.0, maxval=1.0)

    log_dict = {}
    loss_results, log_dict = module.forward(sr, hr, log_dict)
    jax.block_until_ready(loss_results)
    print("KERNEL_OK")
</pallas_src>

<mosaic_0001>
module attributes {stable_mosaic.version = 11 : i64} {
  func.func @kernel(%arg0: i32, %arg1: memref<6x16x16xf32, #tpu.memory_space<vmem>>, %arg2: memref<6x16x16xf32, #tpu.memory_space<vmem>>, %arg3: memref<16x128xf32, #tpu.memory_space<vmem>>, %arg4: memref<8x16xf32, #tpu.memory_space<vmem>>, %arg5: memref<1x3x128xf32, #tpu.memory_space<vmem>>) attributes {dimension_semantics = [#tpu.dimension_semantics<parallel>], iteration_bounds = array<i64: 1>, scalar_prefetch = 0 : i64, scratch_operands = 0 : i64, tpu.core_type = #tpu.core_type<tc>, window_params = [{transform_indices = @transform_0, window_bounds = array<i64: 6, 16, 16>}, {transform_indices = @transform_1, window_bounds = array<i64: 6, 16, 16>}, {pipeline_mode = #tpu.pipeline_mode<synchronous>, transform_indices = @transform_2, window_bounds = array<i64: 16, 128>}, {pipeline_mode = #tpu.pipeline_mode<synchronous>, transform_indices = @transform_3, window_bounds = array<i64: 8, 16>}, {transform_indices = @transform_4, window_bounds = array<i64: 1, 3, 128>}]} {
    %c0 = arith.constant 0 : index
    %c0_0 = arith.constant 0 : index
    %c0_1 = arith.constant 0 : index
    %0 = vector.load %arg1[%c0, %c0_0, %c0_1] : memref<6x16x16xf32, #tpu.memory_space<vmem>>, vector<6x16x16xf32>
    %c0_2 = arith.constant 0 : index
    %c0_3 = arith.constant 0 : index
    %c0_4 = arith.constant 0 : index
    %1 = vector.load %arg2[%c0_2, %c0_3, %c0_4] : memref<6x16x16xf32, #tpu.memory_space<vmem>>, vector<6x16x16xf32>
    %c0_5 = arith.constant 0 : index
    %c0_6 = arith.constant 0 : index
    %2 = vector.load %arg3[%c0_5, %c0_6] : memref<16x128xf32, #tpu.memory_space<vmem>>, vector<16x128xf32>
    %c0_7 = arith.constant 0 : index
    %c0_8 = arith.constant 0 : index
    %3 = vector.load %arg4[%c0_7, %c0_8] : memref<8x16xf32, #tpu.memory_space<vmem>>, vector<8x16xf32>
    %4 = vector.shape_cast %0 : vector<6x16x16xf32> to vector<96x16xf32>
    %5 = vector.shape_cast %1 : vector<6x16x16xf32> to vector<96x16xf32>
    %6 = arith.mulf %4, %4 : vector<96x16xf32>
    %7 = arith.mulf %5, %5 : vector<96x16xf32>
    %8 = arith.mulf %4, %5 : vector<96x16xf32>
    %9 = tpu.concatenate %4, %5, %6, %7, %8 in 0 : vector<96x16xf32>, vector<96x16xf32>, vector<96x16xf32>, vector<96x16xf32>, vector<96x16xf32> -> vector<480x16xf32>
    %cst = arith.constant dense<0.000000e+00> : vector<480x128xf32>
    %10 = tpu.matmul %9, %2, %cst {dimension_numbers = #tpu.dot_dimension_numbers<[1], [0], [0], [1], [0, 0, 1, 1], [], []>} : vector<480x16xf32>, vector<16x128xf32>, vector<480x128xf32> -> vector<480x128xf32>
    %11 = vector.extract_strided_slice %10 {offsets = [0, 0], sizes = [16, 128], strides = [1, 1]} : vector<480x128xf32> to vector<16x128xf32>
    %12 = vector.extract_strided_slice %10 {offsets = [16, 0], sizes = [16, 128], strides = [1, 1]} : vector<480x128xf32> to vector<16x128xf32>
    %13 = vector.extract_strided_slice %10 {offsets = [32, 0], sizes = [16, 128], strides = [1, 1]} : vector<480x128xf32> to vector<16x128xf32>
    %14 = vector.extract_strided_slice %10 {offsets = [48, 0], sizes = [16, 128], strides = [1, 1]} : vector<480x128xf32> to vector<16x128xf32>
    %15 = vector.extract_strided_slice %10 {offsets = [64, 0], sizes = [16, 128], strides = [1, 1]} : vector<480x128xf32> to vector<16x128xf32>
    %16 = vector.extract_strided_slice %10 {offsets = [80, 0], sizes = [16, 128], strides = [1, 1]} : vector<480x128xf32> to vector<16x128xf32>
    %17 = vector.extract_strided_slice %10 {offsets = [96, 0], sizes = [16, 128], strides = [1, 1]} : vector<480x128xf32> to vector<16x128xf32>
    %18 = vector.extract_strided_slice %10 {offsets = [112, 0], sizes = [16, 128], strides = [1, 1]} : vector<480x128xf32> to vector<16x128xf32>
    %19 = vector.extract_strided_slice %10 {offsets = [128, 0], sizes = [16, 128], strides = [1, 1]} : vector<480x128xf32> to vector<16x128xf32>
    %20 = vector.extract_strided_slice %10 {offsets = [144, 0], sizes = [16, 128], strides = [1, 1]} : vector<480x128xf32> to vector<16x128xf32>
    %21 = vector.extract_strided_slice %10 {offsets = [160, 0], sizes = [16, 128], strides = [1, 1]} : vector<480x128xf32> to vector<16x128xf32>
    %22 = vector.extract_strided_slice %10 {offsets = [176, 0], sizes = [16, 128], strides = [1, 1]} : vector<480x128xf32> to vector<16x128xf32>
    %23 = vector.extract_strided_slice %10 {offsets = [192, 0], sizes = [16, 128], strides = [1, 1]} : vector<480x128xf32> to vector<16x128xf32>
    %24 = vector.extract_strided_slice %10 {offsets = [208, 0], sizes = [16, 128], strides = [1, 1]} : vector<480x128xf32> to vector<16x128xf32>
    %25 = vector.extract_strided_slice %10 {offsets = [224, 0], sizes = [16, 128], strides = [1, 1]} : vector<480x128xf32> to vector<16x128xf32>
    %26 = vector.extract_strided_slice %10 {offsets = [240, 0], sizes = [16, 128], strides = [1, 1]} : vector<480x128xf32> to vector<16x128xf32>
    %27 = vector.extract_strided_slice %10 {offsets = [256, 0], sizes = [16, 128], strides = [1, 1]} : vector<480x128xf32> to vector<16x128xf32>
    %28 = vector.extract_strided_slice %10 {offsets = [272, 0], sizes = [16, 128], strides = [1, 1]} : vector<480x128xf32> to vector<16x128xf32>
    %29 = vector.extract_strided_slice %10 {offsets = [288, 0], sizes = [16, 128], strides = [1, 1]} : vector<480x128xf32> to vector<16x128xf32>
    %30 = vector.extract_strided_slice %10 {offsets = [304, 0], sizes = [16, 128], strides = [1, 1]} : vector<480x128xf32> to vector<16x128xf32>
    %31 = vector.extract_strided_slice %10 {offsets = [320, 0], sizes = [16, 128], strides = [1, 1]} : vector<480x128xf32> to vector<16x128xf32>
    %32 = vector.extract_strided_slice %10 {offsets = [336, 0], sizes = [16, 128], strides = [1, 1]} : vector<480x128xf32> to vector<16x128xf32>
    %33 = vector.extract_strided_slice %10 {offsets = [352, 0], sizes = [16, 128], strides = [1, 1]} : vector<480x128xf32> to vector<16x128xf32>
    %34 = vector.extract_strided_slice %10 {offsets = [368, 0], sizes = [16, 128], strides = [1, 1]} : vector<480x128xf32> to vector<16x128xf32>
    %35 = vector.extract_strided_slice %10 {offsets = [384, 0], sizes = [16, 128], strides = [1, 1]} : vector<480x128xf32> to vector<16x128xf32>
    %36 = vector.extract_strided_slice %10 {offsets = [400, 0], sizes = [16, 128], strides = [1, 1]} : vector<480x128xf32> to vector<16x128xf32>
    %37 = vector.extract_strided_slice %10 {offsets = [416, 0], sizes = [16, 128], strides = [1, 1]} : vector<480x128xf32> to vector<16x128xf32>
    %38 = vector.extract_strided_slice %10 {offsets = [432, 0], sizes = [16, 128], strides = [1, 1]} : vector<480x128xf32> to vector<16x128xf32>
    %39 = vector.extract_strided_slice %10 {offsets = [448, 0], sizes = [16, 128], strides = [1, 1]} : vector<480x128xf32> to vector<16x128xf32>
    %40 = vector.extract_strided_slice %10 {offsets = [464, 0], sizes = [16, 128], strides = [1, 1]} : vector<480x128xf32> to vector<16x128xf32>
    %41 = tpu.concatenate %11, %12, %13, %14, %15, %16, %17, %18, %19, %20, %21, %22, %23, %24, %25, %26 in 1 : vector<16x128xf32>, vector<16x128xf32>, vector<16x128xf32>, vector<16x128xf32>, vector<16x128xf32>, vector<16x128xf32>, vector<16x128xf32>, vector<16x128xf32>, vector<16x128xf32>, vector<16x128xf32>, vector<16x128xf32>, vector<16x128xf32>, vector<16x128xf32>, vector<16x128xf32>, vector<16x128xf32>, vector<16x128xf32> -> vector<16x2048xf32>
    %42 = tpu.concatenate %27, %28, %29, %30, %31, %32, %33, %34, %35, %36, %37, %38, %39, %40 in 1 : vector<16x128xf32>, vector<16x128xf32>, vector<16x128xf32>, vector<16x128xf32>, vector<16x128xf32>, vector<16x128xf32>, vector<16x128xf32>, vector<16x128xf32>, vector<16x128xf32>, vector<16x128xf32>, vector<16x128xf32>, vector<16x128xf32>, vector<16x128xf32>, vector<16x128xf32> -> vector<16x1792xf32>
    %43 = tpu.concatenate %41, %42 in 1 : vector<16x2048xf32>, vector<16x1792xf32> -> vector<16x3840xf32>
    %cst_9 = arith.constant dense<0.000000e+00> : vector<8x3840xf32>
    %44 = tpu.matmul %3, %43, %cst_9 {dimension_numbers = #tpu.dot_dimension_numbers<[1], [0], [0], [1], [0, 0, 1, 1], [], []>} : vector<8x16xf32>, vector<16x3840xf32>, vector<8x3840xf32> -> vector<8x3840xf32>
    %45 = vector.extract_strided_slice %44 {offsets = [0, 0], sizes = [8, 768], strides = [1, 1]} : vector<8x3840xf32> to vector<8x768xf32>
    %46 = vector.extract_strided_slice %44 {offsets = [0, 768], sizes = [8, 768], strides = [1, 1]} : vector<8x3840xf32> to vector<8x768xf32>
    %47 = vector.extract_strided_slice %44 {offsets = [0, 1536], sizes = [8, 768], strides = [1, 1]} : vector<8x3840xf32> to vector<8x768xf32>
    %48 = vector.extract_strided_slice %44 {offsets = [0, 2304], sizes = [8, 768], strides = [1, 1]} : vector<8x3840xf32> to vector<8x768xf32>
    %49 = vector.extract_strided_slice %44 {offsets = [0, 3072], sizes = [8, 768], strides = [1, 1]} : vector<8x3840xf32> to vector<8x768xf32>
    %50 = arith.mulf %45, %45 : vector<8x768xf32>
    %51 = arith.mulf %46, %46 : vector<8x768xf32>
    %52 = arith.mulf %45, %46 : vector<8x768xf32>
    %53 = arith.subf %47, %50 : vector<8x768xf32>
    %54 = arith.subf %48, %51 : vector<8x768xf32>
    %55 = arith.subf %49, %52 : vector<8x768xf32>
    %cst_10 = arith.constant 2.000000e+00 : f32
    %56 = vector.broadcast %cst_10 : f32 to vector<8x768xf32>
    %57 = arith.mulf %56, %52 : vector<8x768xf32>
    %cst_11 = arith.constant 9.99999974E-5 : f32
    %58 = vector.broadcast %cst_11 : f32 to vector<8x768xf32>
    %59 = arith.addf %57, %58 : vector<8x768xf32>
    %cst_12 = arith.constant 2.000000e+00 : f32
    %60 = vector.broadcast %cst_12 : f32 to vector<8x768xf32>
    %61 = arith.mulf %60, %55 : vector<8x768xf32>
    %cst_13 = arith.constant 8.99999984E-4 : f32
    %62 = vector.broadcast %cst_13 : f32 to vector<8x768xf32>
    %63 = arith.addf %61, %62 : vector<8x768xf32>
    %64 = arith.mulf %59, %63 : vector<8x768xf32>
    %65 = arith.addf %50, %51 : vector<8x768xf32>
    %cst_14 = arith.constant 9.99999974E-5 : f32
    %66 = vector.broadcast %cst_14 : f32 to vector<8x768xf32>
    %67 = arith.addf %65, %66 : vector<8x768xf32>
    %68 = arith.addf %53, %54 : vector<8x768xf32>
    %cst_15 = arith.constant 8.99999984E-4 : f32
    %69 = vector.broadcast %cst_15 : f32 to vector<8x768xf32>
    %70 = arith.addf %68, %69 : vector<8x768xf32>
    %71 = arith.mulf %67, %70 : vector<8x768xf32>
    %72 = arith.divf %64, %71 : vector<8x768xf32>
    %cst_16 = arith.constant 1.000000e+00 : f32
    %73 = vector.broadcast %cst_16 : f32 to vector<8x768xf32>
    %74 = arith.subf %72, %73 : vector<8x768xf32>
    %cst_17 = arith.constant dense<0.000000e+00> : vector<8xf32>
    %75 = vector.multi_reduction <add>, %74, %cst_17 [1] : vector<8x768xf32> to vector<8xf32>
    %76 = vector.shape_cast %75 : vector<8xf32> to vector<8x1xf32>
    %cst_18 = arith.constant dense<0.000000e+00> : vector<1xf32>
    %77 = vector.multi_reduction <add>, %76, %cst_18 [0] : vector<8x1xf32> to vector<1xf32>
    %78 = vector.shape_cast %77 : vector<1xf32> to vector<1x1xf32>
    %cst_19 = arith.constant 1.000000e+00 : f32
    %79 = vector.broadcast %cst_19 : f32 to vector<96x16xf32>
    %80 = arith.subf %4, %79 : vector<96x16xf32>
    %cst_20 = arith.constant 0.000000e+00 : f32
    %81 = vector.broadcast %cst_20 : f32 to vector<96x16xf32>
    %82 = arith.maximumf %80, %81 : vector<96x16xf32>
    %cst_21 = arith.constant 0.000000e+00 : f32
    %83 = vector.broadcast %cst_21 : f32 to vector<96x16xf32>
    %84 = arith.subf %83, %4 : vector<96x16xf32>
    %cst_22 = arith.constant 0.000000e+00 : f32
    %85 = vector.broadcast %cst_22 : f32 to vector<96x16xf32>
    %86 = arith.maximumf %84, %85 : vector<96x16xf32>
    %87 = arith.addf %82, %86 : vector<96x16xf32>
    %cst_23 = arith.constant dense<0.000000e+00> : vector<96xf32>
    %88 = vector.multi_reduction <add>, %87, %cst_23 [1] : vector<96x16xf32> to vector<96xf32>
    %89 = vector.shape_cast %88 : vector<96xf32> to vector<96x1xf32>
    %cst_24 = arith.constant dense<0.000000e+00> : vector<1xf32>
    %90 = vector.multi_reduction <add>, %89, %cst_24 [0] : vector<96x1xf32> to vector<1xf32>
    %91 = vector.shape_cast %90 : vector<1xf32> to vector<1x1xf32>
    %92 = arith.subf %0, %1 : vector<6x16x16xf32>
    %93 = vector.extract_strided_slice %92 {offsets = [0, 0, 1], sizes = [6, 16, 15], strides = [1, 1, 1]} : vector<6x16x16xf32> to vector<6x16x15xf32>
    %94 = vector.extract_strided_slice %92 {offsets = [0, 0, 0], sizes = [6, 16, 15], strides = [1, 1, 1]} : vector<6x16x16xf32> to vector<6x16x15xf32>
    %95 = arith.subf %93, %94 : vector<6x16x15xf32>
    %96 = vector.extract_strided_slice %92 {offsets = [0, 1, 0], sizes = [6, 15, 16], strides = [1, 1, 1]} : vector<6x16x16xf32> to vector<6x15x16xf32>
    %97 = vector.extract_strided_slice %92 {offsets = [0, 0, 0], sizes = [6, 15, 16], strides = [1, 1, 1]} : vector<6x16x16xf32> to vector<6x15x16xf32>
    %98 = arith.subf %96, %97 : vector<6x15x16xf32>
    %99 = math.absf %95 : vector<6x16x15xf32>
    %cst_25 = arith.constant dense<0.000000e+00> : vector<6x16xf32>
    %100 = vector.multi_reduction <add>, %99, %cst_25 [2] : vector<6x16x15xf32> to vector<6x16xf32>
    %101 = vector.shape_cast %100 : vector<6x16xf32> to vector<6x16x1xf32>
    %cst_26 = arith.constant dense<0.000000e+00> : vector<6x1xf32>
    %102 = vector.multi_reduction <add>, %101, %cst_26 [1] : vector<6x16x1xf32> to vector<6x1xf32>
    %103 = vector.shape_cast %102 : vector<6x1xf32> to vector<6x1x1xf32>
    %cst_27 = arith.constant dense<0.000000e+00> : vector<1x1xf32>
    %104 = vector.multi_reduction <add>, %103, %cst_27 [0] : vector<6x1x1xf32> to vector<1x1xf32>
    %105 = math.absf %98 : vector<6x15x16xf32>
    %cst_28 = arith.constant dense<0.000000e+00> : vector<6x15xf32>
    %106 = vector.multi_reduction <add>, %105, %cst_28 [2] : vector<6x15x16xf32> to vector<6x15xf32>
    %107 = vector.shape_cast %106 : vector<6x15xf32> to vector<6x15x1xf32>
    %cst_29 = arith.constant dense<0.000000e+00> : vector<6x1xf32>
    %108 = vector.multi_reduction <add>, %107, %cst_29 [1] : vector<6x15x1xf32> to vector<6x1xf32>
    %109 = vector.shape_cast %108 : vector<6x1xf32> to vector<6x1x1xf32>
    %cst_30 = arith.constant dense<0.000000e+00> : vector<1x1xf32>
    %110 = vector.multi_reduction <add>, %109, %cst_30 [0] : vector<6x1x1xf32> to vector<1x1xf32>
    %111 = arith.addf %104, %110 : vector<1x1xf32>
    %112 = tpu.concatenate %78, %91, %111 in 0 : vector<1x1xf32>, vector<1x1xf32>, vector<1x1xf32> -> vector<3x1xf32>
    %113 = vector.shape_cast %112 : vector<3x1xf32> to vector<3x1xf32>
    %114 = vector.broadcast %113 : vector<3x1xf32> to vector<3x128xf32>
    %c0_31 = arith.constant 0 : index
    %c0_32 = arith.constant 0 : index
    %c0_33 = arith.constant 0 : index
    %115 = vector.load %arg5[%c0_31, %c0_32, %c0_33] : memref<1x3x128xf32, #tpu.memory_space<vmem>>, vector<1x3x128xf32>
    %116 = vector.shape_cast %115 : vector<1x3x128xf32> to vector<3x128xf32>
    %117 = vector.shape_cast %114 : vector<3x128xf32> to vector<1x3x128xf32>
    tpu.vector_store %arg5[%c0_31, %c0_32, %c0_33], %117 {strides = array<i32>} : memref<1x3x128xf32, #tpu.memory_space<vmem>>, vector<1x3x128xf32>,
    return
  }
  func.func @transform_0(%arg0: i32) -> (i32, i32, i32) {
    %c0_i32 = arith.constant 0 : i32
    %c0_i32_0 = arith.constant 0 : i32
    %c0_i32_1 = arith.constant 0 : i32
    return %arg0, %c0_i32, %c0_i32_0 : i32, i32, i32
  }
  func.func @transform_1(%arg0: i32) -> (i32, i32, i32) {
    %c0_i32 = arith.constant 0 : i32
    %c0_i32_0 = arith.constant 0 : i32
    %c0_i32_1 = arith.constant 0 : i32
    return %arg0, %c0_i32, %c0_i32_0 : i32, i32, i32
  }
  func.func @transform_2(%arg0: i32) -> (i32, i32) {
    %c0_i32 = arith.constant 0 : i32
    %c0_i32_0 = arith.constant 0 : i32
    %c0_i32_1 = arith.constant 0 : i32
    return %c0_i32, %c0_i32_0 : i32, i32
  }
  func.func @transform_3(%arg0: i32) -> (i32, i32) {
    %c0_i32 = arith.constant 0 : i32
    %c0_i32_0 = arith.constant 0 : i32
    %c0_i32_1 = arith.constant 0 : i32
    return %c0_i32, %c0_i32_0 : i32, i32
  }
  func.func @transform_4(%arg0: i32) -> (i32, i32, i32) {
    %c0_i32 = arith.constant 0 : i32
    %c0_i32_0 = arith.constant 0 : i32
    %c0_i32_1 = arith.constant 0 : i32
    return %arg0, %c0_i32, %c0_i32_0 : i32, i32, i32
  }
}

</mosaic_0001>

<bundles_post_ra>
// kernel: precise_losses_pallas.1
= control target key start
LH: loop header
LB: loop body
LE: loop exit
PB: predicated region body
PF: predicated region fallthrough
CT: control target
= control target key end

     0   :  { %9 = vsyncpa [#allocation3], 0  ;;  %s3296_s0 = inlined_call_operand.hbm [shape: f32[6,16,16], index: 0, kind: input, shape index: {}]   ;;  %s3297_s1 = inlined_call_operand.hbm [shape: f32[6,16,16], index: 1, kind: input, shape index: {}]   ;;  %s3298_s2 = inlined_call_operand.hbm [shape: f32[16,128], index: 2, kind: input, shape index: {}]   ;;  %s3299_s3 = inlined_call_operand.vmem [shape: f32[8,16], index: 3, kind: input, shape index: {}]   ;;  %s3300_s4 = inlined_call_operand.vmem [shape: f32[1,3,128], index: 4, kind: output, shape index: {}]  }
   0x1   :  { %10 = vsyncpa [#allocation5], 0  ;;  %s2734_s15 = smov [#allocation4]   ;;  %s2735_s17 = smov [#allocation2]  }
   0x2   :  { %s28_s16 = sshll.u32 %s2734_s15, 4  ;;  %s16_s18 = sshll.u32 %s2735_s17, 4  ;;  %s29_s16 = int_to_ptr.vmem [resolvable:$true] %s28_s16  ;;  %s17_s18 = int_to_ptr.vmem [resolvable:$true] %s16_s18 }
   0x3   :  { %s2678_s19 = scalar_lea.vmem %s29_s16, 1536  ;;  %p2683_p1 = scmp.lt.s32.totalorder %s29_s16, %s29_s16 }
   0x4   :  { %p2679_p0 = scmp.ne.s32.totalorder %s29_s16, %s2678_s19  ;;  %p2684_p2 = scmp.lt.s32.totalorder %s2678_s19, %s2678_s19 }
   0x6   :  { %p2685_p3 = por %p2684_p2, %p2683_p1 }
   0x8   :  { %p2686_p4 = pnand %p2685_p3, %p2679_p0 }
   0xa   :  { %2689 = shalt.err (!%p2686_p4)
}
   0xb   :  { %s2736_s20 = smov 128   ;;  %s2737_s21 = smov 8  }
   0xc   :  { %34 = dma.hbm_to_vmem [thread:$0]  %s3297_s1, 1536, %s29_s16, [#allocation5], %s2736_s20, %s2736_s20, %s2737_s21  }
   0xd   :  { %s2698_s24 = scalar_lea.vmem %s17_s18, 1536  ;;  %p2703_p6 = scmp.lt.s32.totalorder %s17_s18, %s17_s18 }
   0xe   :  { %p2699_p5 = scmp.ne.s32.totalorder %s17_s18, %s2698_s24  ;;  %p2704_p7 = scmp.lt.s32.totalorder %s2698_s24, %s2698_s24 }
  0x10   :  { %p2705_p8 = por %p2704_p7, %p2703_p6 }
  0x12   :  { %p2706_p9 = pnand %p2705_p8, %p2699_p5 }
  0x14   :  { %2709 = shalt.err (!%p2706_p9)
}
  0x15   :  { %22 = dma.hbm_to_vmem [thread:$0]  %s3296_s0, 1536, %s17_s18, [#allocation3], %s2736_s20, %s2736_s20, %s2737_s21  }
  0x16   :  { %s2738_s27 = smov [#allocation6]  }
  0x17   :  { %s40_s28 = sshll.u32 %s2738_s27, 4  ;;  %s41_s28 = int_to_ptr.vmem [resolvable:$true] %s40_s28 }
  0x18   :  { %s2718_s29 = scalar_lea.vmem %s41_s28, 256  ;;  %p2723_p11 = scmp.lt.s32.totalorder %s41_s28, %s41_s28 }
  0x19   :  { %p2719_p10 = scmp.ne.s32.totalorder %s41_s28, %s2718_s29  ;;  %p2724_p12 = scmp.lt.s32.totalorder %s2718_s29, %s2718_s29 }
  0x1b   :  { %p2725_p13 = por %p2724_p12, %p2723_p11 }
  0x1d   :  { %p2726_p0 = pnand %p2725_p13, %p2719_p10 }
  0x1f   :  { %2729 = shalt.err (!%p2726_p0)
}
  0x20   :  { %46 = dma.hbm_to_vmem [thread:$0]  %s3298_s2, 256, %s41_s28, [#allocation5], %s2736_s20, %s2736_s20, %s2737_s21  }
  0x21   :  { %2730 = dma.done.wait [#allocation3], 1536  }
  0x22   :  { %2731 = vsyncadd [#allocation3], 4294965760 }
  0x23   :  { %2732 = dma.done.wait [#allocation5], 1792  }
  0x24   :  { %2733 = vsyncadd [#allocation5], 4294965504  ;;  %vm121_vm0 = vcmask 130048   ;;  %v83_v0 = vld [vmem:[#allocation6 + $0x8] sm:$0xff]  ;;  %v82_v1 = vld [vmem:[#allocation6] sm:$0xff]  ;;  %s2739_s0 = smov 1  }
  0x25   :  { %v2777_v2 = vld [vmem:[#allocation2] sm:$0xff]  ;;  %2550 = vmatprep.subr.mxu0 %v83_v0  ;;  %v2781_v3 = vld [vmem:[#allocation2 + $0x8] sm:$0xff]  ;;  %2644 = vmatprep.subr.mxu1 %v83_v0  ;;  %v2783_v4 = vld [vmem:[#allocation2 + $0x10] sm:$0xff]  ;;  %vm2047_vm1 = vcmask 1040384   ;;  %vm2246_vm2 = vcmask 130049   ;;  %s2741_s2 = smov 127  }
  0x26   :  { %2554 = vmatprep.mubr.msk.f32.mxu0 %vm121_vm0, %v2777_v2  ;;  %2551 = vmatpush3.msra.mxu0 %v83_v0  ;;  %v2785_v5 = vld [vmem:[#allocation4] sm:$0xff]  ;;  %v2789_v6 = vld [vmem:[#allocation4 + $0x10] sm:$0xff]  ;;  %v2797_v8 = vld [vmem:[#allocation2 + $0x18] sm:$0xff]  ;;  %v2476_v52 = vadd.f32 -1.0, %v2777_v2  ;;  %v1886_v53 = vsub.f32 0.0, %v2777_v2  ;;  %v85_v54 = vmul.f32 %v2777_v2, %v2777_v2  ;;  %v2478_v55 = vadd.f32 -1.0, %v2783_v4 }
  0x27   :  { %2552 = vmatprep.subr.mxu0 %v82_v1  ;;  %2646 = vmatpush3.msra.mxu1 %v83_v0  ;;  %v2793_v7 = vsub.f32 %v2777_v2, %v2785_v5  ;;  %v2799_v9 = vld [vmem:[#allocation4 + $0x8] sm:$0xff]  ;;  %v2803_v10 = vsub.f32 %v2783_v4, %v2789_v6  ;;  %v2805_v11 = vld [vmem:[#allocation2 + $0x20] sm:$0xff]  ;;  %v2807_v12 = vld [vmem:[#allocation4 + $0x18] sm:$0xff]  ;;  %v109_v19 = vmul.f32 %v2785_v5, %v2777_v2  ;;  %v1888_v56 = vsub.f32 0.0, %v2783_v4 }
  0x28   :  { %2553 = vmatpush3.msra.mxu0 %v82_v1  ;;  %2645 = vmatprep.subr.mxu1 %v82_v1  ;;  %v2813_v13 = vsub.f32 %v2781_v3, %v2799_v9  ;;  %v2815_v14 = vld [vmem:[#allocation4 + $0x50] sm:$0xff]  ;;  %v2817_v15 = vld [vmem:[#allocation4 + $0x58] sm:$0xff]  ;;  %v2823_v16 = vsub.f32 %v2797_v8, %v2807_v12  ;;  %v2835_v20 = vld [vmem:[#allocation2 + $0x28] sm:$0xff]  ;;  %v110_v26 = vmul.f32 %v2799_v9, %v2781_v3  ;;  %v1874_v57 = vmax.f32 %v2476_v52, 0.0 }
  0x29   :  { %2555 = vmatmul.mubr.msk.f32.vlgmr.msra.gmra.mxu0 %vm121_vm0, %v2781_v3  ;;  %1999 = vrot.lane.b32.xlu0 %v2793_v7, %s2739_s0  ;;  %v107_v17 = vmul.f32 %v2815_v14, %v2815_v14  ;;  %v108_v18 = vmul.f32 %v2817_v15, %v2817_v15  ;;  %v2837_v21 = vld [vmem:[#allocation4 + $0x20] sm:$0xff]  ;;  %v2839_v22 = vld [vmem:[#allocation2 + $0x30] sm:$0xff]  ;;  %v2841_v23 = vld [vmem:[#allocation4 + $0x28] sm:$0xff]  ;;  %v111_v27 = vmul.f32 %v2789_v6, %v2783_v4  ;;  %v1898_v58 = vmax.f32 %v1886_v53, 0.0 }
  0x2a   :  { %2557 = vmatprep.mubr.msk.f32.mxu0 %vm121_vm0, %v2783_v4  ;;  %2647 = vmatpush3.msra.mxu1 %v82_v1  ;;  %v2848_v24 = vsub.f32 %v2805_v11, %v2837_v21  ;;  %v2854_v25 = vsub.f32 %v2835_v20, %v2841_v23  ;;  %v2866_v28 = vld [vmem:[#allocation2 + $0x38] sm:$0xff]  ;;  %v2868_v29 = vld [vmem:[#allocation4 + $0x30] sm:$0xff]  ;;  %v2870_v30 = vld [vmem:[#allocation2 + $0x40] sm:$0xff]  ;;  %v112_v34 = vmul.f32 %v2807_v12, %v2797_v8  ;;  %v2477_v60 = vadd.f32 -1.0, %v2781_v3 }
  0x2b   :  { %2003 = vrot.lane.b32.xlu1 %v2803_v10, %s2739_s0  ;;  %2623 = vmatprep.mubr.msk.f32.mxu1 %vm121_vm0, %v107_v17  ;;  %v2872_v31 = vld [vmem:[#allocation4 + $0x38] sm:$0xff]  ;;  %v2878_v32 = vsub.f32 %v2839_v22, %v2868_v29  ;;  %v113_v35 = vmul.f32 %v2837_v21, %v2805_v11  ;;  %v2896_v36 = vld [vmem:[#allocation2 + $0x48] sm:$0xff]  ;;  %v2898_v37 = vld [vmem:[#allocation4 + $0x40] sm:$0xff]  ;;  %v114_v42 = vmul.f32 %v2841_v23, %v2835_v20  ;;  %v1887_v61 = vsub.f32 0.0, %v2781_v3 }
  0x2c   :  { %2624 = vmatmul.mubr.msk.f32.vlgmr.msra.gmra.mxu1 %vm121_vm0, %v108_v18  ;;  %v2884_v33 = vsub.f32 %v2866_v28, %v2872_v31  ;;  %v2900_v38 = vld [vmem:[#allocation2 + $0x50] sm:$0xff]  ;;  %v2902_v39 = vld [vmem:[#allocation4 + $0x48] sm:$0xff]  ;;  %v2908_v40 = vsub.f32 %v2870_v30, %v2898_v37  ;;  %v115_v43 = vmul.f32 %v2868_v29, %v2839_v22  ;;  %v2926_v44 = vld [vmem:[#allocation2 + $0x58] sm:$0xff]  ;;  %v116_v47 = vmul.f32 %v2872_v31, %v2866_v28 }
  0x2d   :  { %2558 = vmatmul.mubr.msk.f32.gmra.mxu0 %vm121_vm0, %v2797_v8  ;;  %2001 = vrot.lane.b32.xlu0 %v2813_v13, %s2739_s0  ;;  %v2914_v41 = vsub.f32 %v2896_v36, %v2902_v39  ;;  %v2932_v45 = vsub.f32 %v2900_v38, %v2815_v14  ;;  %v2939_v46 = vsub.f32 %v2926_v44, %v2817_v15  ;;  %v1876_v63 = vmax.f32 %v2478_v55, 0.0 }
  0x2e   :  { %2560 = vmatprep.mubr.msk.f32.mxu0 %vm121_vm0, %v2805_v11  ;;  %2626 = vmatprep.mubr.msk.f32.mxu1 %vm121_vm0, %v109_v19  ;;  %v117_v48 = vmul.f32 %v2898_v37, %v2870_v30  ;;  %v118_v49 = vmul.f32 %v2902_v39, %v2896_v36  ;;  %v119_v50 = vmul.f32 %v2815_v14, %v2900_v38  ;;  %v1900_v0 = vmax.f32 %v1888_v56, 0.0 }
  0x2f   :  { %2005 = vrot.lane.b32.xlu1 %v2823_v16, %s2739_s0  ;;  %v120_v51 = vmul.f32 %v2817_v15, %v2926_v44  ;;  %v86_v59 = vmul.f32 %v2781_v3, %v2781_v3  ;;  %v87_v62 = vmul.f32 %v2783_v4, %v2783_v4  ;;  %v1910_v1 = vadd.f32 %v1898_v58, %v1874_v57 }
  0x30   :  { %2627 = vmatmul.mubr.msk.f32.gmra.mxu1 %vm121_vm0, %v110_v26  ;;  %v2479_v2 = vadd.f32 -1.0, %v2797_v8  ;;  %v1875_v17 = vmax.f32 %v2477_v60, 0.0  ;;  %v1899_v18 = vmax.f32 %v1887_v61, 0.0  ;;  %v2480_v3 = vadd.f32 -1.0, %v2805_v11 }
  0x31   :  { %2561 = vmatmul.mubr.msk.f32.gmra.mxu0 %vm121_vm0, %v2835_v20  ;;  %2007 = vrot.lane.b32.xlu0 %v2848_v24, %s2739_s0  ;;  %v1890_v19 = vsub.f32 0.0, %v2805_v11  ;;  %v89_v4 = vmul.f32 %v2805_v11, %v2805_v11  ;;  %v1912_v26 = vadd.f32 %v1900_v0, %v1876_v63  ;;  %v91_v11 = vmul.f32 %v2839_v22, %v2839_v22 }
  0x32   :  { %2563 = vmatprep.mubr.msk.f32.mxu0 %vm121_vm0, %v2839_v22  ;;  %2629 = vmatprep.mubr.msk.f32.mxu1 %vm121_vm0, %v111_v27  ;;  %v2049_v27 = vrot.slane %v2813_v13, 7  ;;  %v2052_v52 = vrot.slane %v2823_v16, 7  ;;  %v92_v56 = vmul.f32 %v2866_v28, %v2866_v28  ;;  %v93_v60 = vmul.f32 %v2870_v30, %v2870_v30 }
  0x33   :  { %2009 = vrot.lane.b32.xlu1 %v2854_v25, %s2739_s0  ;;  %v1928_v53 = vsel %vm121_vm0, %v1912_v26, 0.0  ;;  %vm2295_vm3 = vcmask 1046528   ;;  %vm2150_vm4 = vcmask 121856   ;;  %vm2381_vm5 = vcmask 1041408  }
  0x34   :  { %2630 = vmatmul.mubr.msk.f32.gmra.mxu1 %vm121_vm0, %v112_v34  ;;  %v1922_v34 = vsel %vm121_vm0, %v1910_v1, 0.0  ;;  %v2481_v1 = vadd.f32 -1.0, %v2835_v20 }
  0x35   :  { %2564 = vmatmul.mubr.msk.f32.gmra.mxu0 %vm121_vm0, %v2866_v28  ;;  %2011 = vrot.lane.b32.xlu0 %v2878_v32, %s2739_s0 }
  0x36   :  { %2566 = vmatprep.mubr.msk.f32.mxu0 %vm121_vm0, %v2870_v30  ;;  %2632 = vmatprep.mubr.msk.f32.mxu1 %vm121_vm0, %v113_v35 }
  0x37   :  { %2013 = vrot.lane.b32.xlu1 %v2884_v33, %s2739_s0 }
  0x38   :  { %2633 = vmatmul.mubr.msk.f32.gmra.mxu1 %vm121_vm0, %v114_v42  ;;  %v2048_v42 = vrot.slane %v2793_v7, 7 }
  0x39   :  { %2567 = vmatmul.mubr.msk.f32.gmra.mxu0 %vm121_vm0, %v2896_v36  ;;  %2015 = vrot.lane.b32.xlu0 %v2908_v40, %s2739_s0 }
  0x3a   :  { %2569 = vmatprep.mubr.msk.f32.mxu0 %vm121_vm0, %v2900_v38  ;;  %2635 = vmatprep.mubr.msk.f32.mxu1 %vm121_vm0, %v115_v43  ;;  %v90_v43 = vmul.f32 %v2835_v20, %v2835_v20  ;;  %v2078_v55 = vsub.f32 %v2793_v7, %v2048_v42 }
  0x3b   :  { %2017 = vrot.lane.b32.xlu1 %v2914_v41, %s2739_s0 }
  0x3c   :  { %2636 = vmatmul.mubr.msk.f32.gmra.mxu1 %vm121_vm0, %v116_v47  ;;  %v1911_v47 = vadd.f32 %v1899_v18, %v1875_v17  ;;  %v2234_v0 = vand.u32 2147483647, %v2078_v55  ;;  %v94_v17 = vmul.f32 %v2896_v36, %v2896_v36 }
  0x3d   :  { %2570 = vmatmul.mubr.msk.f32.gmra.mxu0 %vm121_vm0, %v2926_v44  ;;  %2019 = vrot.lane.b32.xlu0 %v2932_v45, %s2739_s0 }
  0x3e   :  { %2572 = vmatprep.mubr.msk.f32.mxu0 %vm121_vm0, %v2785_v5  ;;  %2638 = vmatprep.mubr.msk.f32.mxu1 %vm121_vm0, %v117_v48  ;;  %v1878_v48 = vmax.f32 %v2480_v3, 0.0  ;;  %v1925_v57 = vsel %vm121_vm0, %v1911_v47, 0.0 }
  0x3f   :  { %2021 = vrot.lane.b32.xlu1 %v2939_v46, %s2739_s0 }
  0x40   :  { %2639 = vmatmul.mubr.msk.f32.gmra.mxu1 %vm121_vm0, %v118_v49  ;;  %v1902_v49 = vmax.f32 %v1890_v19, 0.0 }
  0x41   :  { %2573 = vmatmul.mubr.msk.f32.gmra.mxu0 %vm121_vm0, %v2799_v9  ;;  %2641 = vmatprep.mubr.msk.f32.mxu1 %vm121_vm0, %v119_v50  ;;  %v2050_v50 = vsel %vm2047_vm1, %v2048_v42, %v2049_v27  ;;  %v1879_v27 = vmax.f32 %v2481_v1, 0.0 }
  0x42   :  { %2575 = vmatprep.mubr.msk.f32.mxu0 %vm121_vm0, %v2789_v6  ;;  %v1914_v58 = vadd.f32 %v1902_v49, %v1878_v48  ;;  %v97_v48 = vmul.f32 %v2785_v5, %v2785_v5  ;;  %v99_v5 = vmul.f32 %v2789_v6, %v2789_v6 }
  0x44   :  { %2642 = vmatmul.mubr.msk.f32.gmra.mxu1 %vm121_vm0, %v120_v51  ;;  %v2051_v51 = vrot.slane %v2803_v10, 7  ;;  %v1934_v18 = vsel %vm121_vm0, %v1914_v58, 0.0  ;;  %v102_v58 = vmul.f32 %v2841_v23, %v2841_v23 }
  0x45   :  { %2576 = vmatmul.mubr.msk.f32.gmra.mxu0 %vm121_vm0, %v2807_v12 }
  0x46   :  { %2578 = vmatprep.mubr.msk.f32.mxu0 %vm121_vm0, %v2837_v21  ;;  %v2080_v61 = vsub.f32 %v2803_v10, %v2051_v51 }
  0x48   :  { %v2236_v26 = vand.u32 2147483647, %v2080_v61 }
  0x49   :  { %2579 = vmatmul.mubr.msk.f32.gmra.mxu0 %vm121_vm0, %v2841_v23  ;;  %v106_v23 = vmul.f32 %v2902_v39, %v2902_v39 }
  0x4a   :  { %2581 = vmatprep.mubr.msk.f32.mxu0 %vm121_vm0, %v2868_v29  ;;  %v2253_v49 = vsel %vm2246_vm2, %v2236_v26, 0.0 }
  0x4d   :  { %2582 = vmatmul.mubr.msk.f32.gmra.mxu0 %vm121_vm0, %v2872_v31 }
  0x4e   :  { %2584 = vmatprep.mubr.msk.f32.mxu0 %vm121_vm0, %v2898_v37 }
  0x51   :  { %2585 = vmatmul.mubr.msk.f32.gmra.mxu0 %vm121_vm0, %v2902_v39 }
  0x52   :  { %2587 = vmatprep.mubr.msk.f32.mxu0 %vm121_vm0, %v2815_v14  ;;  %v1889_v14 = vsub.f32 0.0, %v2797_v8 }
  0x54   :  { %v1901_v35 = vmax.f32 %v1889_v14, 0.0  ;;  %v2054_v14 = vrot.slane %v2848_v24, 7 }
  0x55   :  { %2588 = vmatmul.mubr.msk.f32.gmra.mxu0 %vm121_vm0, %v2817_v15  ;;  %v88_v15 = vmul.f32 %v2797_v8, %v2797_v8  ;;  %v1877_v8 = vmax.f32 %v2479_v2, 0.0  ;;  %v1891_v2 = vsub.f32 0.0, %v2835_v20  ;;  %v95_v20 = vmul.f32 %v2900_v38, %v2900_v38 }
  0x56   :  { %2590 = vmatprep.mubr.msk.f32.mxu0 %vm121_vm0, %v85_v54  ;;  %v2082_v47 = vsub.f32 %v2848_v24, %v2054_v14 }
  0x57   :  { %v1913_v54 = vadd.f32 %v1901_v35, %v1877_v8  ;;  %v96_v35 = vmul.f32 %v2926_v44, %v2926_v44 }
  0x59   :  { %2591 = vmatmul.mubr.msk.f32.gmra.mxu0 %vm121_vm0, %v86_v59  ;;  %v2079_v59 = vsub.f32 %v2813_v13, %v2050_v50  ;;  %v1931_v63 = vsel %vm121_vm0, %v1913_v54, 0.0 }
  0x5a   :  { %2593 = vmatprep.mubr.msk.f32.mxu0 %vm121_vm0, %v87_v62  ;;  %v2053_v62 = vsel %vm2047_vm1, %v2051_v51, %v2052_v52  ;;  %v98_v51 = vmul.f32 %v2799_v9, %v2799_v9 }
  0x5b   :  { %v2235_v3 = vand.u32 2147483647, %v2079_v59  ;;  %v2081_v19 = vsub.f32 %v2823_v16, %v2053_v62  ;;  %v2740_v59 = vmov 0.0  }
  0x5c   :  { %1923 = vadd.xlane.f32.xlu0 %v1922_v34  ;;  %v1903_v34 = vmax.f32 %v1891_v2, 0.0  ;;  %734 = vmatprep.mubr.f32.mxu1 %v2740_v59 }
  0x5d   :  { %2594 = vmatmul.mubr.msk.f32.gmra.mxu0 %vm121_vm0, %v88_v15  ;;  %v2055_v15 = vrot.slane %v2854_v25, 7  ;;  %v2250_v42 = vsel %vm121_vm0, %v2235_v3, 0.0 }
  0x5e   :  { %2596 = vmatprep.mubr.msk.f32.mxu0 %vm121_vm0, %v89_v4  ;;  %v2247_v4 = vsel %vm2246_vm2, %v2234_v0, 0.0 }
  0x5f   :  { %v2056_v8 = vsel %vm2047_vm1, %v2054_v14, %v2055_v15 }
  0x60   :  { %1929 = vadd.xlane.f32.xlu0 %v1928_v53  ;;  %v2083_v50 = vsub.f32 %v2854_v25, %v2056_v8  ;;  %v2238_v53 = vand.u32 2147483647, %v2082_v47 }
  0x61   :  { %2597 = vmatmul.mubr.msk.f32.gmra.mxu0 %vm121_vm0, %v90_v43  ;;  %v2237_v43 = vand.u32 2147483647, %v2081_v19 }
  0x62   :  { %2599 = vmatprep.mubr.msk.f32.mxu0 %vm121_vm0, %v91_v11  ;;  %v1915_v11 = vadd.f32 %v1903_v34, %v1879_v27  ;;  %v2239_v55 = vand.u32 2147483647, %v2083_v50  ;;  %v2259_v9 = vsel %vm2246_vm2, %v2238_v53, 0.0  ;;  %v1893_v53 = vsub.f32 0.0, %v2866_v28 }
  0x63   :  { %1926 = vadd.xlane.f32.xlu1 %v1925_v57  ;;  %v2256_v52 = vsel %vm121_vm0, %v2237_v43, 0.0  ;;  %v101_v57 = vmul.f32 %v2837_v21, %v2837_v21  ;;  %v104_v21 = vmul.f32 %v2872_v31, %v2872_v31 }
  0x64   :  { %1932 = vadd.xlane.f32.xlu0 %v1931_v63  ;;  %v1937_v54 = vsel %vm121_vm0, %v1915_v11, 0.0  ;;  %v2262_v6 = vsel %vm121_vm0, %v2239_v55, 0.0  ;;  %v2061_v55 = vrot.slane %v2914_v41, 7 }
  0x65   :  { %2600 = vmatmul.mubr.msk.f32.gmra.mxu0 %vm121_vm0, %v92_v56  ;;  %v100_v56 = vmul.f32 %v2807_v12, %v2807_v12  ;;  %v103_v12 = vmul.f32 %v2868_v29, %v2868_v29 }
  0x66   :  { %2602 = vmatprep.mubr.msk.f32.mxu0 %vm121_vm0, %v93_v60  ;;  %v105_v60 = vmul.f32 %v2898_v37, %v2898_v37 }
  0x67   :  { %1935 = vadd.xlane.f32.xlu1 %v1934_v18 }
  0x68   :  { %2248 = vadd.xlane.f32.xlu0 %v2247_v4 }
  0x69   :  { %2603 = vmatmul.mubr.msk.f32.gmra.mxu0 %vm121_vm0, %v94_v17 }
  0x6a   :  { %2605 = vmatprep.mubr.msk.f32.mxu0 %vm121_vm0, %v95_v20 }
  0x6b   :  { %2251 = vadd.xlane.f32.xlu1 %v2250_v42 }
  0x6c   :  { %2254 = vadd.xlane.f32.xlu0 %v2253_v49 }
  0x6d   :  { %2606 = vmatmul.mubr.msk.f32.gmra.mxu0 %vm121_vm0, %v96_v35 }
  0x6e   :  { %2608 = vmatprep.mubr.msk.f32.mxu0 %vm121_vm0, %v97_v48 }
  0x6f   :  { %2257 = vadd.xlane.f32.xlu1 %v2256_v52  ;;  %v2483_v52 = vadd.f32 -1.0, %v2866_v28 }
  0x70   :  { %1938 = vadd.xlane.f32.xlu0 %v1937_v54  ;;  %v2060_v54 = vrot.slane %v2908_v40, 7 }
  0x71   :  { %2609 = vmatmul.mubr.msk.f32.gmra.mxu0 %vm121_vm0, %v98_v51  ;;  %v2057_v51 = vrot.slane %v2878_v32, 7 }
  0x72   :  { %2611 = vmatprep.mubr.msk.f32.mxu0 %vm121_vm0, %v99_v5 }
  0x73   :  { %2260 = vadd.xlane.f32.xlu1 %v2259_v9  ;;  %v2084_v5 = vsub.f32 %v2878_v32, %v2057_v51  ;;  %v1892_v9 = vsub.f32 0.0, %v2839_v22 }
  0x74   :  { %2263 = vadd.xlane.f32.xlu0 %v2262_v6  ;;  %v1905_v6 = vmax.f32 %v1893_v53, 0.0 }
  0x75   :  { %2612 = vmatmul.mubr.msk.f32.gmra.mxu0 %vm121_vm0, %v100_v56  ;;  %v2482_v56 = vadd.f32 -1.0, %v2839_v22 }
  0x76   :  { %2614 = vmatprep.mubr.msk.f32.mxu0 %vm121_vm0, %v101_v57  ;;  %v1881_v57 = vmax.f32 %v2483_v52, 0.0 }
  0x78   :  { %v1917_v28 = vadd.f32 %v1905_v6, %v1881_v57 }
  0x79   :  { %2615 = vmatmul.mubr.msk.f32.gmra.mxu0 %vm121_vm0, %v102_v58  ;;  %v2240_v58 = vand.u32 2147483647, %v2084_v5 }
  0x7a   :  { %2617 = vmatprep.mubr.msk.f32.mxu0 %vm121_vm0, %v103_v12  ;;  %v2062_v12 = vsel %vm2047_vm1, %v2060_v54, %v2061_v55  ;;  %v1943_v22 = vsel %vm121_vm0, %v1917_v28, 0.0 }
  0x7d   :  { %2618 = vmatmul.mubr.msk.f32.gmra.mxu0 %vm121_vm0, %v104_v21  ;;  %v2058_v21 = vrot.slane %v2884_v33, 7 }
  0x7e   :  { %2620 = vmatprep.mubr.msk.f32.mxu0 %vm121_vm0, %v105_v60  ;;  %v1880_v60 = vmax.f32 %v2482_v56, 0.0 }
  0x81   :  { %2621 = vmatmul.mubr.msk.f32.gmra.mxu0 %vm121_vm0, %v106_v23  ;;  %v1904_v23 = vmax.f32 %v1892_v9, 0.0 }
  0x9b   :  { %v2000_v29 = vpop.permute.xlu0 %1999 }
  0x9c   :  { %v2035_v61 = vsub.f32 %v2793_v7, %v2000_v29  ;;  %v2087_v29 = vsub.f32 %v2914_v41, %v2062_v12 }
  0x9d   :  { %v2004_v62 = vpop.permute.xlu1 %2003 }
  0x9e   :  { %v2037_v31 = vsub.f32 %v2803_v10, %v2004_v62  ;;  %v2090_v63 = vand.u32 2147483647, %v2035_v61  ;;  %v2063_v61 = vrot.slane %v2932_v45, 7  ;;  %v2059_v62 = vsel %vm2047_vm1, %v2057_v51, %v2058_v21 }
  0x9f   :  { %v2002_v0 = vpop.permute.xlu0 %2001 }
  0xa0   :  { %v2092_v1 = vand.u32 2147483647, %v2037_v31  ;;  %v2036_v37 = vsub.f32 %v2813_v13, %v2002_v0  ;;  %2114 = vrot.lane.b32.xlu0 %v2090_v63, %s2741_s2  ;;  %v1916_v31 = vadd.f32 %v1904_v23, %v1880_v60  ;;  %v2243_v63 = vand.u32 2147483647, %v2087_v29 }
  0xa1   :  { %v2006_v2 = vpop.permute.xlu1 %2005  ;;  %v2088_v0 = vsub.f32 %v2932_v45, %v2063_v61 }
  0xa2   :  { %v2038_v39 = vsub.f32 %v2823_v16, %v2006_v2  ;;  %v2091_v14 = vand.u32 2147483647, %v2036_v37  ;;  %v1895_v37 = vsub.f32 0.0, %v2896_v36  ;;  %v2085_v2 = vsub.f32 %v2884_v33, %v2059_v62 }
  0xa3   :  { %v2008_v15 = vpop.permute.xlu0 %2007 }
  0xa4   :  { %v2093_v17 = vand.u32 2147483647, %v2038_v39  ;;  %2116 = vrot.lane.b32.xlu1 %v2091_v14, %s2741_s2  ;;  %v2039_v18 = vsub.f32 %v2848_v24, %v2008_v15  ;;  %2118 = vrot.lane.b32.xlu0 %v2092_v1, %s2741_s2  ;;  %v2485_v1 = vadd.f32 -1.0, %v2896_v36  ;;  %v1940_v39 = vsel %vm121_vm0, %v1916_v31, 0.0 }
  0xa5   :  { %v2010_v7 = vpop.permute.xlu1 %2009  ;;  %v2244_v14 = vand.u32 2147483647, %v2088_v0 }
  0xa6   :  { %v2040_v10 = vsub.f32 %v2854_v25, %v2010_v7  ;;  %v2094_v3 = vand.u32 2147483647, %v2039_v18  ;;  %v1883_v15 = vmax.f32 %v2485_v1, 0.0  ;;  %v2241_v7 = vand.u32 2147483647, %v2085_v2 }
  0xa7   :  { %v2012_v13 = vpop.permute.xlu0 %2011  ;;  %v2086_v18 = vsub.f32 %v2908_v40, %v2060_v54 }
  0xa8   :  { %v2095_v19 = vand.u32 2147483647, %v2040_v10  ;;  %2120 = vrot.lane.b32.xlu1 %v2093_v17, %s2741_s2  ;;  %v2041_v16 = vsub.f32 %v2878_v32, %v2012_v13  ;;  %2122 = vrot.lane.b32.xlu0 %v2094_v3, %s2741_s2  ;;  %v2265_v32 = vsel %vm2246_vm2, %v2240_v58, 0.0  ;;  %v1907_v17 = vmax.f32 %v1895_v37, 0.0 }
  0xa9   :  { %v2014_v20 = vpop.permute.xlu1 %2013  ;;  %v2484_v10 = vadd.f32 -1.0, %v2870_v30  ;;  %v2064_v3 = vrot.slane %v2939_v46, 7  ;;  %v2268_v13 = vsel %vm121_vm0, %v2241_v7, 0.0 }
  0xaa   :  { %v2042_v4 = vsub.f32 %v2884_v33, %v2014_v20  ;;  %v2096_v26 = vand.u32 2147483647, %v2041_v16  ;;  %v2277_v33 = vsel %vm2246_vm2, %v2244_v14, 0.0  ;;  %v1919_v36 = vadd.f32 %v1907_v17, %v1883_v15 }
  0xab   :  { %v2016_v27 = vpop.permute.xlu0 %2015  ;;  %v1882_v20 = vmax.f32 %v2484_v10, 0.0 }
  0xac   :  { %v2097_v34 = vand.u32 2147483647, %v2042_v4  ;;  %2124 = vrot.lane.b32.xlu1 %v2095_v19, %s2741_s2  ;;  %v2043_v25 = vsub.f32 %v2908_v40, %v2016_v27  ;;  %2126 = vrot.lane.b32.xlu0 %v2096_v26, %s2741_s2  ;;  %v2242_v19 = vand.u32 2147483647, %v2086_v18  ;;  %v2065_v4 = vsel %vm2047_vm1, %v2063_v61, %v2064_v3 }
  0xad   :  { %v2018_v24 = vpop.permute.xlu1 %2017  ;;  %v1949_v40 = vsel %vm121_vm0, %v1919_v36, 0.0  ;;  %v2089_v27 = vsub.f32 %v2939_v46, %v2065_v4 }
  0xae   :  { %v2044_v8 = vsub.f32 %v2914_v41, %v2018_v24  ;;  %v2098_v35 = vand.u32 2147483647, %v2043_v25  ;;  %v2274_v41 = vsel %vm121_vm0, %v2243_v63, 0.0 }
  0xaf   :  { %v2020_v42 = vpop.permute.xlu0 %2019  ;;  %v2245_v25 = vand.u32 2147483647, %v2089_v27 }
  0xb0   :  { %v2099_v43 = vand.u32 2147483647, %v2044_v8  ;;  %2128 = vrot.lane.b32.xlu1 %v2097_v34, %s2741_s2  ;;  %v2045_v47 = vsub.f32 %v2932_v45, %v2020_v42  ;;  %2130 = vrot.lane.b32.xlu0 %v2098_v35, %s2741_s2  ;;  %v1894_v45 = vsub.f32 0.0, %v2870_v30  ;;  %v2271_v30 = vsel %vm2246_vm2, %v2242_v19, 0.0 }
  0xb1   :  { %v2022_v48 = vpop.permute.xlu1 %2021 }
  0xb2   :  { %v2046_v49 = vsub.f32 %v2939_v46, %v2022_v48  ;;  %v2100_v11 = vand.u32 2147483647, %v2045_v47  ;;  %v1906_v16 = vmax.f32 %v1894_v45, 0.0  ;;  %v3153_v46 = vld [vmem:[%s3299_s3] sm:$0xff] }
  0xb4   :  { %2132 = vrot.lane.b32.xlu1 %v2099_v43, %s2741_s2  ;;  %v2101_v50 = vand.u32 2147483647, %v2046_v49  ;;  %2134 = vrot.lane.b32.xlu0 %v2100_v11, %s2741_s2  ;;  %v1918_v26 = vadd.f32 %v1906_v16, %v1882_v20  ;;  %v2280_v43 = vsel %vm121_vm0, %v2245_v25, 0.0 }
  0xb6   :  { %v1946_v24 = vsel %vm121_vm0, %v1918_v26, 0.0 }
  0xb8   :  { %2136 = vrot.lane.b32.xlu1 %v2101_v50, %s2741_s2 }
  0xd3   :  { %2266 = vadd.xlane.f32.xlu0 %v2265_v32 }
  0xd7   :  { %1944 = vadd.xlane.f32.xlu0 %v1943_v22 }
  0xdb   :  { %2275 = vadd.xlane.f32.xlu0 %v2274_v41 }
  0xdc   :  { %1941 = vadd.xlane.f32.xlu1 %v1940_v39 }
  0xdf   :  { %2278 = vadd.xlane.f32.xlu0 %v2277_v33 }
  0xe0   :  { %2269 = vadd.xlane.f32.xlu1 %v2268_v13 }
  0xe3   :  { %1950 = vadd.xlane.f32.xlu0 %v1949_v40 }
  0xe4   :  { %2272 = vadd.xlane.f32.xlu1 %v2271_v30 }
  0xe5   :  { %v1924_v34 = vpop.xlane.xlu0 %1923 }
  0xe8   :  { %1947 = vadd.xlane.f32.xlu1 %v1946_v24 }
  0xe9   :  { %v2556_v8 = vpop.f32.mrf.mxu0  ;;  %v1930_v42 = vpop.xlane.xlu0 %1929 }
  0xeb   :  { %v368_v35 = vpop.f32.mrf.mxu0 }
  0xec   :  { %v1927_v48 = vpop.xlane.xlu1 %1926  ;;  %2281 = vadd.xlane.f32.xlu1 %v2280_v43 }
  0xed   :  { %v2559_v47 = vpop.f32.mrf.mxu0  ;;  %v1958_v49 = vadd.f32 %v1927_v48, %v1924_v34  ;;  %v1933_v50 = vpop.xlane.xlu0 %1932 }
  0xee   :  { %698 = vmatprep.subr.mxu1 %v2559_v47 }
  0xef   :  { %v378_v11 = vpop.f32.mrf.mxu0  ;;  %699 = vmatpush1.msra.mxu1 %v2556_v8  ;;  %v1959_v51 = vadd.f32 %v1958_v49, %v1930_v42 }
  0xf0   :  { %700 = vmatprep.subr.mxu1 %v378_v11  ;;  %v1936_v53 = vpop.xlane.xlu1 %1935 }
  0xf1   :  { %v2562_v52 = vpop.f32.mrf.mxu0  ;;  %701 = vmatpush1.msra.mxu1 %v368_v35  ;;  %v1960_v5 = vadd.f32 %v1959_v51, %v1933_v50  ;;  %v2249_v55 = vpop.xlane.xlu0 %2248 }
  0xf2   :  { %2455 = vmatmul.mubr.msk.f32.vlgmr.msra.gmra.mxu1 %vm121_vm0, %v3153_v46  ;;  %v2296_v9 = vrot.slane %v2249_v55, 1 }
  0xf3   :  { %v388_v54 = vpop.f32.mrf.mxu0  ;;  %805 = vmatprep.mubr.f32.mxu1 %v2740_v59  ;;  %v1961_v56 = vadd.f32 %v1960_v5, %v1936_v53 }
  0xf4   :  { %v2252_v6 = vpop.xlane.xlu1 %2251 }
  0xf5   :  { %v2565_v57 = vpop.f32.mrf.mxu0  ;;  %v2297_v58 = vrot.slane %v2252_v6, 1  ;;  %v2255_v21 = vpop.xlane.xlu0 %2254 }
  0xf6   :  { %769 = vmatprep.subr.mxu1 %v2565_v57  ;;  %v2299_v28 = vrot.slane %v2255_v21, 1  ;;  %v3181_v21 = vpop.f32.mrf.mxu1 }
  0xf7   :  { %v398_v12 = vpop.f32.mrf.mxu0  ;;  %770 = vmatpush1.msra.mxu1 %v2562_v52  ;;  %v2298_v60 = vsel %vm2295_vm3, %v2296_v9, %v2297_v58  ;;  %v2326_v23 = vsel %vm2295_vm3, %v2297_v58, 0.0 }
  0xf8   :  { %771 = vmatprep.subr.mxu1 %v398_v12  ;;  %v2327_v29 = vadd.f32 %v2326_v23, %v2298_v60  ;;  %v2258_v61 = vpop.xlane.xlu1 %2257 }
  0xf9   :  { %v2568_v32 = vpop.f32.mrf.mxu0  ;;  %772 = vmatpush1.msra.mxu1 %v388_v54  ;;  %v2300_v62 = vrot.slane %v2258_v61, 1  ;;  %v1939_v63 = vpop.xlane.xlu0 %1938 }
  0xfa   :  { %2456 = vmatmul.mubr.msk.f32.vlgmr.msra.gmra.mxu1 %vm121_vm0, %v3153_v46  ;;  %v2328_v22 = vrot.slane %v2327_v29, 4  ;;  %v3165_v37 = vadd.f32 %v1961_v56, %v1939_v63 }
  0xfb   :  { %v408_v31 = vpop.f32.mrf.mxu0  ;;  %876 = vmatprep.mubr.f32.mxu1 %v2740_v59  ;;  %v2301_v0 = vsel %vm2295_vm3, %v2299_v28, %v2300_v62  ;;  %v2334_v1 = vsel %vm2295_vm3, %v2300_v62, 0.0  ;;  %v3188_v62 = vpop.f32.mrf.mxu1 }
  0xfc   :  { %v2329_v39 = vadd.f32 %v2328_v22, %v2327_v29  ;;  %v2335_v41 = vadd.f32 %v2334_v1, %v2301_v0  ;;  %v2261_v14 = vpop.xlane.xlu1 %2260 }
  0xfd   :  { %v2571_v2 = vpop.f32.mrf.mxu0  ;;  %v2302_v15 = vrot.slane %v2261_v14, 1  ;;  %v2264_v10 = vpop.xlane.xlu0 %2263 }
  0xfe   :  { %840 = vmatprep.subr.mxu1 %v2571_v2  ;;  %v2330_v7 = vrot.slane %v2329_v39, 2  ;;  %v2336_v18 = vrot.slane %v2335_v41, 4  ;;  %v2303_v45 = vrot.slane %v2264_v10, 1 }
  0xff   :  { %v418_v17 = vpop.f32.mrf.mxu0  ;;  %841 = vmatpush1.msra.mxu1 %v2568_v32 }
 0x100   :  { %842 = vmatprep.subr.mxu1 %v418_v17  ;;  %v2331_v33 = vadd.f32 %v2330_v7, %v2329_v39  ;;  %v2337_v36 = vadd.f32 %v2336_v18, %v2335_v41  ;;  %v2304_v13 = vsel %vm2295_vm3, %v2302_v15, %v2303_v45  ;;  %v2342_v19 = vsel %vm2295_vm3, %v2303_v45, 0.0  ;;  %v3192_v39 = vpop.f32.mrf.mxu1 }
 0x101   :  { %v2574_v3 = vpop.f32.mrf.mxu0  ;;  %843 = vmatpush1.msra.mxu1 %v408_v31  ;;  %v2343_v40 = vadd.f32 %v2342_v19, %v2304_v13  ;;  %v2486_v17 = vadd.f32 -1.0, %v2900_v38  ;;  %v1896_v7 = vsub.f32 0.0, %v2900_v38  ;;  %v2487_v45 = vadd.f32 -1.0, %v2926_v44 }
 0x102   :  { %2457 = vmatmul.mubr.msk.f32.vlgmr.msra.gmra.mxu1 %vm121_vm0, %v3153_v46  ;;  %v2332_v16 = vrot.slane %v2331_v33, 1  ;;  %v2338_v4 = vrot.slane %v2337_v36, 2 }
 0x103   :  { %v428_v20 = vpop.f32.mrf.mxu0  ;;  %947 = vmatprep.mubr.f32.mxu1 %v2740_v59  ;;  %v2344_v27 = vrot.slane %v2343_v40, 4 }
 0x104   :  { %v2339_v26 = vadd.f32 %v2338_v4, %v2337_v36  ;;  %v2333_v24 = vadd.f32 %v2332_v16, %v2331_v33  ;;  %v3203_v36 = vpop.f32.mrf.mxu1  ;;  %v1908_v16 = vmax.f32 %v1896_v7, 0.0 }
 0x105   :  { %v2577_v30 = vpop.f32.mrf.mxu0  ;;  %v2345_v8 = vadd.f32 %v2344_v27, %v2343_v40 }
 0x106   :  { %911 = vmatprep.subr.mxu1 %v2577_v30  ;;  %v2340_v25 = vrot.slane %v2339_v26, 1  ;;  %v1885_v30 = vmax.f32 %v2487_v45, 0.0  ;;  %v2631_v27 = vpop.f32.mrf.mxu1 }
 0x107   :  { %v438_v34 = vpop.f32.mrf.mxu0  ;;  %912 = vmatpush1.msra.mxu1 %v2574_v3  ;;  %v2346_v43 = vrot.slane %v2345_v8, 2  ;;  %v1897_v3 = vsub.f32 0.0, %v2926_v44 }
 0x108   :  { %913 = vmatprep.subr.mxu1 %v438_v34  ;;  %v2341_v42 = vadd.f32 %v2340_v25, %v2339_v26 }
 0x109   :  { %v2580_v35 = vpop.f32.mrf.mxu0  ;;  %914 = vmatpush1.msra.mxu1 %v428_v20  ;;  %v2347_v49 = vadd.f32 %v2346_v43, %v2345_v8  ;;  %v1884_v20 = vmax.f32 %v2486_v17, 0.0  ;;  %v1909_v26 = vmax.f32 %v1897_v3, 0.0 }
 0x10a   :  { %2458 = vmatmul.mubr.msk.f32.vlgmr.msra.gmra.mxu1 %vm121_vm0, %v3153_v46  ;;  %v2374_v48 = vadd.f32 %v2341_v42, %v2333_v24 }
 0x10b   :  { %v448_v47 = vpop.f32.mrf.mxu0  ;;  %1018 = vmatprep.mubr.f32.mxu1 %v2740_v59  ;;  %v2348_v50 = vrot.slane %v2347_v49, 1  ;;  %v1920_v8 = vadd.f32 %v1908_v16, %v1884_v20  ;;  %v1921_v42 = vadd.f32 %v1909_v26, %v1885_v30 }
 0x10d   :  { %v2583_v11 = vpop.f32.mrf.mxu0  ;;  %v2349_v52 = vadd.f32 %v2348_v50, %v2347_v49  ;;  %v1955_v50 = vsel %vm121_vm0, %v1921_v42, 0.0 }
 0x10e   :  { %982 = vmatprep.subr.mxu1 %v2583_v11  ;;  %v1952_v11 = vsel %vm121_vm0, %v1920_v8, 0.0 }
 0x10f   :  { %v458_v51 = vpop.f32.mrf.mxu0  ;;  %983 = vmatpush1.msra.mxu1 %v2580_v35  ;;  %v3175_v5 = vadd.f32 %v2374_v48, %v2349_v52 }
 0x110   :  { %984 = vmatprep.subr.mxu1 %v458_v51 }
 0x111   :  { %v2586_v53 = vpop.f32.mrf.mxu0  ;;  %985 = vmatpush1.msra.mxu1 %v448_v47  ;;  %v618_v47 = vpop.f32.mrf.mxu1 }
 0x112   :  { %2459 = vmatmul.mubr.msk.f32.vlgmr.msra.gmra.mxu1 %vm121_vm0, %v3153_v46  ;;  %v2115_v55 = vpop.permute.xlu0 %2114 }
 0x113   :  { %v468_v54 = vpop.f32.mrf.mxu0  ;;  %1089 = vmatprep.mubr.f32.mxu1 %v2740_v59  ;;  %v2151_v9 = vsel %vm2150_vm4, %v2115_v55, 0.0  ;;  %v2634_v52 = vpop.f32.mrf.mxu1 }
 0x114   :  { %2152 = vadd.xlane.f32.xlu1 %v2151_v9 }
 0x115   :  { %v2589_v56 = vpop.f32.mrf.mxu0  ;;  %v628_v55 = vpop.f32.mrf.mxu1 }
 0x116   :  { %1053 = vmatprep.subr.mxu1 %v2589_v56  ;;  %v2117_v6 = vpop.permute.xlu1 %2116  ;;  %v2119_v58 = vpop.permute.xlu0 %2118 }
 0x117   :  { %v478_v57 = vpop.f32.mrf.mxu0  ;;  %1054 = vmatpush1.msra.mxu1 %v2586_v53  ;;  %v2154_v60 = vsel %vm2150_vm4, %v2117_v6, 0.0  ;;  %v2157_v23 = vsel %vm2150_vm4, %v2119_v58, 0.0 }
 0x118   :  { %1055 = vmatprep.subr.mxu1 %v478_v57  ;;  %2155 = vadd.xlane.f32.xlu0 %v2154_v60  ;;  %v2637_v57 = vpop.f32.mrf.mxu1 }
 0x119   :  { %v2592_v12 = vpop.f32.mrf.mxu0  ;;  %1056 = vmatpush1.msra.mxu1 %v468_v54  ;;  %2158 = vadd.xlane.f32.xlu1 %v2157_v23 }
 0x11a   :  { %2460 = vmatmul.mubr.msk.f32.vlgmr.msra.gmra.mxu1 %vm121_vm0, %v3153_v46  ;;  %v2121_v32 = vpop.permute.xlu1 %2120  ;;  %v2123_v29 = vpop.permute.xlu0 %2122 }
 0x11b   :  { %v488_v28 = vpop.f32.mrf.mxu0  ;;  %1160 = vmatprep.mubr.f32.mxu1 %v2740_v59  ;;  %v2160_v31 = vsel %vm2150_vm4, %v2121_v32, 0.0  ;;  %v2163_v0 = vsel %vm2150_vm4, %v2123_v29, 0.0 }
 0x11c   :  { %2161 = vadd.xlane.f32.xlu0 %v2160_v31 }
 0x11d   :  { %v2595_v61 = vpop.f32.mrf.mxu0 }
 0x11e   :  { %1124 = vmatprep.subr.mxu1 %v2595_v61  ;;  %v2125_v63 = vpop.permute.xlu1 %2124  ;;  %v2127_v1 = vpop.permute.xlu0 %2126 }
 0x11f   :  { %v498_v22 = vpop.f32.mrf.mxu0  ;;  %1125 = vmatpush1.msra.mxu1 %v2592_v12  ;;  %v2166_v41 = vsel %vm2150_vm4, %v2125_v63, 0.0  ;;  %v2169_v15 = vsel %vm2150_vm4, %v2127_v1, 0.0  ;;  %v638_v12 = vpop.f32.mrf.mxu1 }
 0x120   :  { %1126 = vmatprep.subr.mxu1 %v498_v22  ;;  %2167 = vadd.xlane.f32.xlu1 %v2166_v41 }
 0x121   :  { %v2598_v2 = vpop.f32.mrf.mxu0  ;;  %1127 = vmatpush1.msra.mxu1 %v488_v28  ;;  %2164 = vadd.xlane.f32.xlu0 %v2163_v0  ;;  %v2640_v28 = vpop.f32.mrf.mxu1 }
 0x122   :  { %2461 = vmatmul.mubr.msk.f32.vlgmr.msra.gmra.mxu1 %vm121_vm0, %v3153_v46  ;;  %v2129_v18 = vpop.permute.xlu1 %2128  ;;  %v2131_v10 = vpop.permute.xlu0 %2130 }
 0x123   :  { %v508_v14 = vpop.f32.mrf.mxu0  ;;  %1231 = vmatprep.mubr.f32.mxu1 %v2740_v59  ;;  %v2172_v13 = vsel %vm2150_vm4, %v2129_v18, 0.0  ;;  %v2175_v4 = vsel %vm2150_vm4, %v2131_v10, 0.0  ;;  %v648_v29 = vpop.f32.mrf.mxu1 }
 0x124   :  { %2170 = vadd.xlane.f32.xlu1 %v2169_v15 }
 0x125   :  { %v2601_v33 = vpop.f32.mrf.mxu0  ;;  %2173 = vadd.xlane.f32.xlu0 %v2172_v13 }
 0x126   :  { %1195 = vmatprep.subr.mxu1 %v2601_v33  ;;  %v2133_v38 = vpop.permute.xlu1 %2132  ;;  %v2135_v40 = vpop.permute.xlu0 %2134 }
 0x127   :  { %v518_v19 = vpop.f32.mrf.mxu0  ;;  %1196 = vmatpush1.msra.mxu1 %v2598_v2  ;;  %v2178_v34 = vsel %vm2150_vm4, %v2133_v38, 0.0  ;;  %v2181_v25 = vsel %vm2150_vm4, %v2135_v40, 0.0 }
 0x128   :  { %1197 = vmatprep.subr.mxu1 %v518_v19  ;;  %2179 = vadd.xlane.f32.xlu1 %v2178_v34 }
 0x129   :  { %v2604_v44 = vpop.f32.mrf.mxu0  ;;  %1198 = vmatpush1.msra.mxu1 %v508_v14  ;;  %2176 = vadd.xlane.f32.xlu0 %v2175_v4 }
 0x12a   :  { %2462 = vmatmul.mubr.msk.f32.vlgmr.msra.gmra.mxu1 %vm121_vm0, %v3153_v46  ;;  %v2137_v35 = vpop.permute.xlu1 %2136 }
 0x12b   :  { %v528_v24 = vpop.f32.mrf.mxu0  ;;  %1302 = vmatprep.mubr.f32.mxu1 %v2740_v59  ;;  %v2184_v48 = vsel %vm2150_vm4, %v2137_v35, 0.0 }
 0x12c   :  { %2182 = vadd.xlane.f32.xlu1 %v2181_v25 }
 0x12d   :  { %v2607_v43 = vpop.f32.mrf.mxu0  ;;  %2185 = vadd.xlane.f32.xlu0 %v2184_v48 }
 0x12e   :  { %1266 = vmatprep.subr.mxu1 %v2607_v43 }
 0x12f   :  { %v538_v49 = vpop.f32.mrf.mxu0  ;;  %1267 = vmatpush1.msra.mxu1 %v2604_v44 }
 0x130   :  { %1268 = vmatprep.subr.mxu1 %v538_v49  ;;  %1953 = vadd.xlane.f32.xlu1 %v1952_v11 }
 0x131   :  { %v2610_v51 = vpop.f32.mrf.mxu0  ;;  %1269 = vmatpush1.msra.mxu1 %v528_v24  ;;  %1956 = vadd.xlane.f32.xlu0 %v1955_v50 }
 0x132   :  { %2463 = vmatmul.mubr.msk.f32.vlgmr.msra.gmra.mxu1 %vm121_vm0, %v3153_v46 }
 0x133   :  { %v548_v53 = vpop.f32.mrf.mxu0  ;;  %1373 = vmatprep.mubr.f32.mxu1 %v2740_v59 }
 0x135   :  { %v2613_v54 = vpop.f32.mrf.mxu0 }
 0x136   :  { %1337 = vmatprep.subr.mxu1 %v2613_v54 }
 0x137   :  { %v558_v56 = vpop.f32.mrf.mxu0  ;;  %1338 = vmatpush1.msra.mxu1 %v2610_v51 }
 0x138   :  { %1339 = vmatprep.subr.mxu1 %v558_v56 }
 0x139   :  { %v2616_v9 = vpop.f32.mrf.mxu0  ;;  %1340 = vmatpush1.msra.mxu1 %v548_v53 }
 0x13a   :  { %2464 = vmatmul.mubr.msk.f32.vlgmr.msra.gmra.mxu1 %vm121_vm0, %v3153_v46 }
 0x13b   :  { %v568_v6 = vpop.f32.mrf.mxu0  ;;  %1444 = vmatprep.mubr.f32.mxu1 %v2740_v59 }
 0x13d   :  { %v2619_v58 = vpop.f32.mrf.mxu0 }
 0x13e   :  { %1408 = vmatprep.subr.mxu1 %v2619_v58 }
 0x13f   :  { %v578_v60 = vpop.f32.mrf.mxu0  ;;  %1409 = vmatpush1.msra.mxu1 %v2616_v9 }
 0x140   :  { %1410 = vmatprep.subr.mxu1 %v578_v60 }
 0x141   :  { %v2622_v23 = vpop.f32.mrf.mxu0  ;;  %1411 = vmatpush1.msra.mxu1 %v568_v6 }
 0x142   :  { %2465 = vmatmul.mubr.msk.f32.vlgmr.msra.gmra.mxu1 %vm121_vm0, %v3153_v46  ;;  %1479 = vmatprep.subr.mxu1 %v3181_v21  ;;  %v2643_v21 = vpop.f32.mrf.mxu1 }
 0x143   :  { %v588_v32 = vpop.f32.mrf.mxu0  ;;  %1480 = vmatpush1.msra.mxu1 %v2622_v23  ;;  %1515 = vmatprep.mubr.f32.mxu1 %v2740_v59 }
 0x144   :  { %1481 = vmatprep.subr.mxu1 %v3188_v62  ;;  %v658_v61 = vpop.f32.mrf.mxu1 }
 0x145   :  { %1482 = vmatpush1.msra.mxu1 %v588_v32 }
 0x146   :  { %2466 = vmatmul.mubr.msk.f32.vlgmr.msra.gmra.mxu1 %vm121_vm0, %v3153_v46  ;;  %1550 = vmatprep.subr.mxu1 %v2631_v27 }
 0x147   :  { %1551 = vmatpush1.msra.mxu1 %v3192_v39  ;;  %1586 = vmatprep.mubr.f32.mxu1 %v2740_v59 }
 0x148   :  { %1552 = vmatprep.subr.mxu1 %v618_v47 }
 0x149   :  { %1553 = vmatpush1.msra.mxu1 %v3203_v36 }
 0x14a   :  { %2467 = vmatmul.mubr.msk.f32.vlgmr.msra.gmra.mxu1 %vm121_vm0, %v3153_v46  ;;  %1621 = vmatprep.subr.mxu1 %v2637_v57 }
 0x14b   :  { %1622 = vmatpush1.msra.mxu1 %v2634_v52  ;;  %1657 = vmatprep.mubr.f32.mxu1 %v2740_v59 }
 0x14c   :  { %1623 = vmatprep.subr.mxu1 %v638_v12 }
 0x14d   :  { %1624 = vmatpush1.msra.mxu1 %v628_v55 }
 0x14e   :  { %2468 = vmatmul.mubr.msk.f32.vlgmr.msra.gmra.mxu1 %vm121_vm0, %v3153_v46  ;;  %1692 = vmatprep.subr.mxu1 %v2643_v21 }
 0x14f   :  { %1693 = vmatpush1.msra.mxu1 %v2640_v28  ;;  %1728 = vmatprep.mubr.f32.mxu1 %v2740_v59 }
 0x150   :  { %1694 = vmatprep.subr.mxu1 %v658_v61 }
 0x151   :  { %1695 = vmatpush1.msra.mxu1 %v648_v29 }
 0x152   :  { %2469 = vmatmul.mubr.msk.f32.vlgmr.msra.gmra.mxu1 %vm121_vm0, %v3153_v46 }
 0x1b2   :  { %v736_v62 = vpop.f32.mrf.mxu1 }
 0x1b3   :  { %v1735_v45 = vmul.f32 %v736_v62, %v736_v62 }
 0x1b4   :  { %v3239_v31 = vpop.f32.mrf.mxu1 }
 0x1b5   :  { %v1736_v36 = vmul.f32 %v3239_v31, %v3239_v31 }
 0x1ba   :  { %v3241_v22 = vpop.f32.mrf.mxu1 }
 0x1bb   :  { %v1737_v27 = vmul.f32 %v3241_v22, %v3241_v22 }
 0x1bc   :  { %v3243_v63 = vpop.f32.mrf.mxu1 }
 0x1bd   :  { %v1738_v8 = vmul.f32 %v3243_v63, %v3243_v63 }
 0x1c2   :  { %v3245_v0 = vpop.f32.mrf.mxu1 }
 0x1c3   :  { %v1739_v48 = vmul.f32 %v3245_v0, %v3245_v0 }
 0x1c4   :  { %v3247_v1 = vpop.f32.mrf.mxu1 }
 0x1c5   :  { %v1740_v55 = vmul.f32 %v3247_v1, %v3247_v1 }
 0x1ca   :  { %v949_v2 = vpop.f32.mrf.mxu1 }
 0x1cb   :  { %v1741_v3 = vmul.f32 %v949_v2, %v949_v2  ;;  %v1747_v6 = vmul.f32 %v949_v2, %v736_v62 }
 0x1cc   :  { %v951_v39 = vpop.f32.mrf.mxu1 }
 0x1cd   :  { %v1742_v13 = vmul.f32 %v951_v39, %v951_v39  ;;  %v1801_v38 = vadd.f32 %v1741_v3, %v1735_v45 }
 0x1cf   :  { %v1802_v40 = vadd.f32 %v1742_v13, %v1736_v36  ;;  %v1807_v35 = vadd.f32 0.0001, %v1801_v38 }
 0x1d1   :  { %v1808_v43 = vadd.f32 0.0001, %v1802_v40 }
 0x1d2   :  { %v3249_v41 = vpop.f32.mrf.mxu1 }
 0x1d3   :  { %v1743_v34 = vmul.f32 %v3249_v41, %v3249_v41 }
 0x1d4   :  { %v3251_v59 = vpop.f32.mrf.mxu1 }
 0x1d5   :  { %v1744_v42 = vmul.f32 %v3251_v59, %v3251_v59  ;;  %v1803_v49 = vadd.f32 %v1743_v34, %v1737_v27 }
 0x1d7   :  { %v1804_v56 = vadd.f32 %v1744_v42, %v1738_v8  ;;  %v1809_v23 = vadd.f32 0.0001, %v1803_v49 }
 0x1da   :  { %v3253_v14 = vpop.f32.mrf.mxu1 }
 0x1db   :  { %v1745_v11 = vmul.f32 %v3253_v14, %v3253_v14 }
 0x1dc   :  { %v3255_v46 = vpop.f32.mrf.mxu1 }
 0x1dd   :  { %v1746_v9 = vmul.f32 %v3255_v46, %v3255_v46  ;;  %v1805_v28 = vadd.f32 %v1745_v11, %v1739_v48 }
 0x1e2   :  { %v1162_v15 = vpop.f32.mrf.mxu1 }
 0x1e3   :  { %v1753_v20 = vsub.f32 %v1162_v15, %v1735_v45  ;;  %v1806_v45 = vadd.f32 %v1746_v9, %v1740_v55 }
 0x1e4   :  { %v1164_v17 = vpop.f32.mrf.mxu1 }
 0x1e5   :  { %v1754_v30 = vsub.f32 %v1164_v17, %v1736_v36  ;;  %v1748_v17 = vmul.f32 %v951_v39, %v3239_v31  ;;  %v1812_v31 = vadd.f32 0.0001, %v1806_v45 }
 0x1e7   :  { %v1772_v40 = vmul.f32 2.0, %v1748_v17 }
 0x1ea   :  { %v1233_v7 = vpop.f32.mrf.mxu1 }
 0x1eb   :  { %v1755_v52 = vsub.f32 %v1233_v7, %v1737_v27  ;;  %v1810_v7 = vadd.f32 0.0001, %v1804_v56 }
 0x1ec   :  { %v1235_v18 = vpop.f32.mrf.mxu1 }
 0x1ed   :  { %v1756_v58 = vsub.f32 %v1235_v18, %v1738_v8 }
 0x1f2   :  { %v1304_v10 = vpop.f32.mrf.mxu1 }
 0x1f3   :  { %v1757_v32 = vsub.f32 %v1304_v10, %v1739_v48 }
 0x1f4   :  { %v1306_v33 = vpop.f32.mrf.mxu1 }
 0x1fa   :  { %v1375_v19 = vpop.f32.mrf.mxu1 }
 0x1fb   :  { %v1759_v16 = vsub.f32 %v1375_v19, %v1741_v3  ;;  %v1758_v3 = vsub.f32 %v1306_v33, %v1740_v55  ;;  %v1771_v19 = vmul.f32 2.0, %v1747_v6 }
 0x1fc   :  { %v1377_v4 = vpop.f32.mrf.mxu1 }
 0x1fd   :  { %v1813_v26 = vadd.f32 %v1759_v16, %v1753_v20  ;;  %v1760_v44 = vsub.f32 %v1377_v4, %v1742_v13  ;;  %v1811_v20 = vadd.f32 0.0001, %v1805_v28 }
 0x1ff   :  { %v1819_v24 = vadd.f32 0.0009, %v1813_v26  ;;  %v1814_v25 = vadd.f32 %v1760_v44, %v1754_v30  ;;  %v1749_v30 = vmul.f32 %v3249_v41, %v3241_v22  ;;  %v1751_v22 = vmul.f32 %v3253_v14, %v3245_v0 }
 0x201   :  { %v1820_v47 = vadd.f32 0.0009, %v1814_v25  ;;  %v1825_v50 = vmul.f32 %v1819_v24, %v1807_v35  ;;  %v1750_v24 = vmul.f32 %v3251_v59, %v3243_v63  ;;  %v1773_v48 = vmul.f32 2.0, %v1749_v30 }
 0x202   :  { %v1446_v51 = vpop.f32.mrf.mxu1  ;;  %v1752_v63 = vmul.f32 %v3255_v46, %v3247_v1  ;;  %v1775_v0 = vmul.f32 2.0, %v1751_v22 }
 0x203   :  { %v1826_v53 = vmul.f32 %v1820_v47, %v1808_v43  ;;  %v1761_v54 = vsub.f32 %v1446_v51, %v1743_v34  ;;  %2658 = vrcp.f32 %v1825_v50  ;;  %v1777_v34 = vadd.f32 0.0001, %v1771_v19 }
 0x204   :  { %v1448_v57 = vpop.f32.mrf.mxu1  ;;  %v1778_v47 = vadd.f32 0.0001, %v1772_v40 }
 0x205   :  { %v1815_v12 = vadd.f32 %v1761_v54, %v1755_v52  ;;  %v1762_v60 = vsub.f32 %v1448_v57, %v1744_v42  ;;  %2660 = vrcp.f32 %v1826_v53  ;;  %v1774_v52 = vmul.f32 2.0, %v1750_v24 }
 0x206   :  { %v1517_v29 = vpop.f32.mrf.mxu1 }
 0x207   :  { %v1821_v21 = vadd.f32 0.0009, %v1815_v12  ;;  %v1816_v61 = vadd.f32 %v1762_v60, %v1756_v58  ;;  %v1763_v15 = vsub.f32 %v1517_v29, %v1745_v11  ;;  %v1779_v58 = vadd.f32 0.0001, %v1773_v48 }
 0x208   :  { %v1519_v36 = vpop.f32.mrf.mxu1 }
 0x209   :  { %v1827_v13 = vmul.f32 %v1821_v21, %v1809_v23  ;;  %v1822_v62 = vadd.f32 0.0009, %v1816_v61  ;;  %v1817_v2 = vadd.f32 %v1763_v15, %v1757_v32  ;;  %v1764_v18 = vsub.f32 %v1519_v36, %v1746_v9 }
 0x20a   :  { %v1588_v16 = vpop.f32.mrf.mxu1  ;;  %v1776_v32 = vmul.f32 2.0, %v1752_v63  ;;  %v1780_v21 = vadd.f32 0.0001, %v1774_v52 }
 0x20b   :  { %2662 = vrcp.f32 %v1827_v13  ;;  %v1828_v10 = vmul.f32 %v1822_v62, %v1810_v7  ;;  %v1823_v38 = vadd.f32 0.0009, %v1817_v2  ;;  %v1818_v4 = vadd.f32 %v1764_v18, %v1758_v3 }
 0x20c   :  { %v1765_v39 = vsub.f32 %v1588_v16, %v1747_v6  ;;  %v1590_v26 = vpop.f32.mrf.mxu1  ;;  %v1781_v7 = vadd.f32 0.0001, %v1775_v0  ;;  %v1782_v62 = vadd.f32 0.0001, %v1776_v32 }
 0x20d   :  { %2664 = vrcp.f32 %v1828_v10  ;;  %v1829_v33 = vmul.f32 %v1823_v38, %v1811_v20  ;;  %v1824_v44 = vadd.f32 0.0009, %v1818_v4  ;;  %v1766_v27 = vsub.f32 %v1590_v26, %v1748_v17 }
 0x20e   :  { %v1783_v25 = vmul.f32 2.0, %v1765_v39  ;;  %v1659_v8 = vpop.f32.mrf.mxu1 }
 0x20f   :  { %2666 = vrcp.f32 %v1829_v33  ;;  %v1830_v35 = vmul.f32 %v1824_v44, %v1812_v31  ;;  %v1784_v42 = vmul.f32 2.0, %v1766_v27  ;;  %v1767_v43 = vsub.f32 %v1659_v8, %v1749_v30  ;;  %v2267_v8 = vpop.xlane.xlu0 %2266 }
 0x210   :  { %v1789_v41 = vadd.f32 0.0009, %v1783_v25  ;;  %v1661_v49 = vpop.f32.mrf.mxu1  ;;  %v2659_v54 = vpop.eup %2658 }
 0x211   :  { %2668 = vrcp.f32 %v1830_v35  ;;  %v1790_v11 = vadd.f32 0.0009, %v1784_v42  ;;  %v1785_v50 = vmul.f32 2.0, %v1767_v43  ;;  %v1768_v51 = vsub.f32 %v1661_v49, %v1750_v24  ;;  %v1942_v25 = vpop.xlane.xlu1 %1941 }
 0x212   :  { %v1795_v59 = vmul.f32 %v1789_v41, %v1777_v34  ;;  %v1730_v53 = vpop.f32.mrf.mxu1  ;;  %v2661_v6 = vpop.eup %2660  ;;  %v2742_v24 = vmov 0  }
 0x213   :  { %v1796_v55 = vmul.f32 %v1790_v11, %v1778_v47  ;;  %v1791_v56 = vadd.f32 0.0009, %v1785_v50  ;;  %v1786_v9 = vmul.f32 2.0, %v1768_v51  ;;  %v1769_v57 = vsub.f32 %v1730_v53, %v1751_v22  ;;  %2657 = vset.pattern.permute.xlu0 %v2742_v24  ;;  %v1945_v42 = vpop.xlane.xlu0 %1944 }
 0x214   :  { %v1732_v14 = vpop.f32.mrf.mxu1  ;;  %v1832_v12 = vmul.f32 %v2659_v54, %v1795_v59  ;;  %v2305_v53 = vrot.slane %v2267_v8, 1 }
 0x215   :  { %v1834_v60 = vmul.f32 %v2661_v6, %v1796_v55  ;;  %v1792_v23 = vadd.f32 0.0009, %v1786_v9  ;;  %v1787_v28 = vmul.f32 2.0, %v1769_v57  ;;  %v1770_v29 = vsub.f32 %v1732_v14, %v1752_v63  ;;  %v2270_v35 = vpop.xlane.xlu1 %2269 }
 0x216   :  { %v1797_v1 = vmul.f32 %v1791_v56, %v1779_v58  ;;  %v2470_v45 = vadd.f32 -1.0, %v1832_v12  ;;  %v2306_v54 = vrot.slane %v2270_v35, 1  ;;  %v1963_v57 = vadd.f32 %v3165_v37, %v1942_v25 }
 0x217   :  { %v2471_v61 = vadd.f32 -1.0, %v1834_v60  ;;  %v1793_v46 = vadd.f32 0.0009, %v1787_v28  ;;  %v1788_v17 = vmul.f32 2.0, %v1770_v29  ;;  %v1798_v36 = vmul.f32 %v1792_v23, %v1780_v21  ;;  %v2276_v47 = vpop.xlane.xlu0 %2275 }
 0x218   :  { %v2663_v15 = vpop.eup %2662  ;;  %v2307_v6 = vsel %vm2295_vm3, %v2305_v53, %v2306_v54  ;;  %v2309_v58 = vrot.slane %v2276_v47, 1  ;;  %v2350_v14 = vsel %vm2295_vm3, %v2306_v54, 0.0  ;;  %v1964_v21 = vadd.f32 %v1963_v57, %v1945_v42 }
 0x219   :  { %v1836_v3 = vmul.f32 %v2663_v15, %v1797_v1  ;;  %v1794_v2 = vadd.f32 0.0009, %v1788_v17  ;;  %v1849_v18 = vadd.f32 %v2471_v61, %v2470_v45  ;;  %v1799_v16 = vmul.f32 %v1793_v46, %v1781_v7  ;;  %v2273_v43 = vpop.xlane.xlu1 %2272 }
 0x21a   :  { %v2665_v13 = vpop.eup %2664  ;;  %v2308_v12 = vrot.slane %v2273_v43, 1  ;;  %v2351_v29 = vadd.f32 %v2350_v14, %v2307_v6  ;;  %v2358_v61 = vsel %vm2295_vm3, %v2309_v58, 0.0 }
 0x21b   :  { %v2472_v19 = vadd.f32 -1.0, %v1836_v3  ;;  %v1838_v20 = vmul.f32 %v2665_v13, %v1798_v36  ;;  %v1800_v40 = vmul.f32 %v1794_v2, %v1782_v62  ;;  %v2279_v22 = vpop.xlane.xlu0 %2278 }
 0x21c   :  { %v2667_v10 = vpop.eup %2666  ;;  %v2311_v1 = vrot.slane %v2279_v22, 1  ;;  %v2310_v46 = vsel %vm2295_vm3, %v2308_v12, %v2309_v58  ;;  %v2352_v36 = vrot.slane %v2351_v29, 4 }
 0x21d   :  { %v2473_v38 = vadd.f32 -1.0, %v1838_v20  ;;  %v1840_v4 = vmul.f32 %v2667_v10, %v1799_v16  ;;  %v1850_v30 = vadd.f32 %v2472_v19, %v1849_v18  ;;  %v1948_v48 = vpop.xlane.xlu1 %1947  ;;  %v2359_v13 = vadd.f32 %v2358_v61, %v2310_v46 }
 0x21e   :  { %v2669_v31 = vpop.eup %2668  ;;  %v1965_v2 = vadd.f32 %v1964_v21, %v1948_v48 }
 0x21f   :  { %v1842_v39 = vmul.f32 %v2669_v31, %v1800_v40  ;;  %v2474_v26 = vadd.f32 -1.0, %v1840_v4  ;;  %v1851_v33 = vadd.f32 %v2473_v38, %v1850_v30  ;;  %v1951_v49 = vpop.xlane.xlu0 %1950  ;;  %v2353_v40 = vadd.f32 %v2352_v36, %v2351_v29 }
 0x220   :  { %v2360_v30 = vrot.slane %v2359_v13, 4 }
 0x221   :  { %v2475_v44 = vadd.f32 -1.0, %v1842_v39  ;;  %v1852_v27 = vadd.f32 %v2474_v26, %v1851_v33  ;;  %v2282_v41 = vpop.xlane.xlu1 %2281  ;;  %v1966_v26 = vadd.f32 %v1965_v2, %v1951_v49  ;;  %v2354_v35 = vrot.slane %v2353_v40, 2 }
 0x222   :  { %v2312_v15 = vrot.slane %v2282_v41, 1  ;;  %v2361_v42 = vadd.f32 %v2360_v30, %v2359_v13 }
 0x223   :  { %v1853_v34 = vadd.f32 %v2475_v44, %v1852_v27  ;;  %v2156_v50 = vpop.xlane.xlu0 %2155 }
 0x224   :  { %v2313_v18 = vsel %vm2295_vm3, %v2311_v1, %v2312_v15  ;;  %v2366_v16 = vsel %vm2295_vm3, %v2312_v15, 0.0  ;;  %v2362_v49 = vrot.slane %v2361_v42, 2 }
 0x225   :  { %1854 = vadd.xlane.f32.xlu1 %v1853_v34  ;;  %v2153_v11 = vpop.xlane.xlu1 %2152  ;;  %v2367_v39 = vadd.f32 %v2366_v16, %v2313_v18 }
 0x226   :  { %v2187_v56 = vadd.f32 %v2156_v50, %v2153_v11 }
 0x227   :  { %v2162_v52 = vpop.xlane.xlu0 %2161  ;;  %v2368_v43 = vrot.slane %v2367_v39, 4 }
 0x228   :  { %v2188_v60 = vrot.slane %v2187_v56, 4 }
 0x229   :  { %v2159_v51 = vpop.xlane.xlu1 %2158 }
 0x22a   :  { %v2194_v9 = vadd.f32 %v2162_v52, %v2159_v51  ;;  %v2189_v37 = vadd.f32 %v2188_v60, %v2187_v56 }
 0x22b   :  { %v2165_v59 = vpop.xlane.xlu0 %2164 }
 0x22c   :  { %v2195_v23 = vrot.slane %v2194_v9, 4  ;;  %v2190_v19 = vrot.slane %v2189_v37, 2 }
 0x22d   :  { %v2168_v63 = vpop.xlane.xlu1 %2167 }
 0x22e   :  { %v2201_v28 = vadd.f32 %v2168_v63, %v2165_v59  ;;  %v2196_v17 = vadd.f32 %v2195_v23, %v2194_v9  ;;  %v2191_v33 = vadd.f32 %v2190_v19, %v2189_v37  ;;  %v2355_v63 = vadd.f32 %v2354_v35, %v2353_v40 }
 0x22f   :  { %v2174_v0 = vpop.xlane.xlu0 %2173  ;;  %v2369_v59 = vadd.f32 %v2368_v43, %v2367_v39 }
 0x230   :  { %v2202_v7 = vrot.slane %v2201_v28, 4  ;;  %v2197_v20 = vrot.slane %v2196_v17, 2  ;;  %v2192_v47 = vrot.slane %v2191_v33, 1  ;;  %v2356_v58 = vrot.slane %v2355_v63, 1 }
 0x231   :  { %v2171_v55 = vpop.xlane.xlu1 %2170  ;;  %v2370_v14 = vrot.slane %v2369_v59, 2 }
 0x232   :  { %v2208_v45 = vadd.f32 %v2174_v0, %v2171_v55  ;;  %v2203_v10 = vadd.f32 %v2202_v7, %v2201_v28  ;;  %v2198_v44 = vadd.f32 %v2197_v20, %v2196_v17  ;;  %v2193_v53 = vadd.f32 %v2192_v47, %v2191_v33 }
 0x233   :  { %v2177_v3 = vpop.xlane.xlu0 %2176  ;;  %v2363_v0 = vadd.f32 %v2362_v49, %v2361_v42  ;;  %v2357_v21 = vadd.f32 %v2356_v58, %v2355_v63  ;;  %v2371_v1 = vadd.f32 %v2370_v14, %v2369_v59 }
 0x234   :  { %v2209_v38 = vrot.slane %v2208_v45, 4  ;;  %v2204_v27 = vrot.slane %v2203_v10, 2  ;;  %v2199_v48 = vrot.slane %v2198_v44, 1 }
 0x235   :  { %v2180_v32 = vpop.xlane.xlu1 %2179  ;;  %v2364_v61 = vrot.slane %v2363_v0, 1  ;;  %v2372_v13 = vrot.slane %v2371_v1, 1 }
 0x236   :  { %v2215_v4 = vadd.f32 %v2180_v32, %v2177_v3  ;;  %v2210_v34 = vadd.f32 %v2209_v38, %v2208_v45  ;;  %v2205_v41 = vadd.f32 %v2204_v27, %v2203_v10  ;;  %v2200_v54 = vadd.f32 %v2199_v48, %v2198_v44 }
 0x237   :  { %v2186_v31 = vpop.xlane.xlu0 %2185  ;;  %v2376_v45 = vadd.f32 %v3175_v5, %v2357_v21  ;;  %v2365_v3 = vadd.f32 %v2364_v61, %v2363_v0  ;;  %v2373_v38 = vadd.f32 %v2372_v13, %v2371_v1 }
 0x238   :  { %v2216_v24 = vrot.slane %v2215_v4, 4  ;;  %v2211_v11 = vrot.slane %v2210_v34, 2  ;;  %v2206_v56 = vrot.slane %v2205_v41, 1  ;;  %v2229_v12 = vadd.f32 %v2200_v54, %v2193_v53 }
 0x239   :  { %v2183_v62 = vpop.xlane.xlu1 %2182  ;;  %v2377_v30 = vadd.f32 %v2376_v45, %v2365_v3 }
 0x23a   :  { %v2222_v25 = vadd.f32 %v2186_v31, %v2183_v62  ;;  %v2217_v50 = vadd.f32 %v2216_v24, %v2215_v4  ;;  %v2212_v9 = vadd.f32 %v2211_v11, %v2210_v34  ;;  %v2207_v23 = vadd.f32 %v2206_v56, %v2205_v41 }
 0x23b   :  { %v1957_v52 = vpop.xlane.xlu0 %1956  ;;  %v2378_v44 = vadd.f32 %v2377_v30, %v2373_v38 }
 0x23c   :  { %v2223_v51 = vrot.slane %v2222_v25, 4  ;;  %v2218_v57 = vrot.slane %v2217_v50, 2  ;;  %v2213_v28 = vrot.slane %v2212_v9, 1  ;;  %v2230_v15 = vadd.f32 %v2229_v12, %v2207_v23 }
 0x23d   :  { %v1954_v8 = vpop.xlane.xlu1 %1953 }
 0x23e   :  { %v1967_v22 = vadd.f32 %v1966_v26, %v1954_v8  ;;  %v2224_v6 = vadd.f32 %v2223_v51, %v2222_v25  ;;  %v2219_v32 = vadd.f32 %v2218_v57, %v2217_v50  ;;  %v2214_v37 = vadd.f32 %v2213_v28, %v2212_v9 }
 0x240   :  { %v1968_v55 = vadd.f32 %v1967_v22, %v1957_v52  ;;  %v2225_v29 = vrot.slane %v2224_v6, 2  ;;  %v2220_v17 = vrot.slane %v2219_v32, 1  ;;  %v2231_v62 = vadd.f32 %v2230_v15, %v2214_v37 }
 0x242   :  { %v1969_v60 = vrot.slane %v1968_v55, 4  ;;  %v2226_v7 = vadd.f32 %v2225_v29, %v2224_v6  ;;  %v2221_v2 = vadd.f32 %v2220_v17, %v2219_v32 }
 0x244   :  { %v1970_v46 = vadd.f32 %v1969_v60, %v1968_v55  ;;  %v2227_v18 = vrot.slane %v2226_v7, 1  ;;  %v2232_v4 = vadd.f32 %v2231_v62, %v2221_v2 }
 0x246   :  { %v1971_v36 = vrot.slane %v1970_v46, 2  ;;  %v2228_v40 = vadd.f32 %v2227_v18, %v2226_v7 }
 0x248   :  { %v1972_v16 = vadd.f32 %v1971_v36, %v1970_v46  ;;  %v2233_v33 = vadd.f32 %v2232_v4, %v2228_v40 }
 0x24a   :  { %v1973_v39 = vrot.slane %v1972_v16, 1  ;;  %v2379_v24 = vadd.f32 %v2378_v44, %v2233_v33 }
 0x24c   :  { %v1974_v27 = vadd.f32 %v1973_v39, %v1972_v16 }
 0x2ae   :  { %v1855_v19 = vpop.xlane.xlu1 %1854 }
 0x2af   :  { %v1856_v20 = vrot.slane %v1855_v19, 4 }
 0x2b1   :  { %v1857_v10 = vadd.f32 %v1856_v20, %v1855_v19 }
 0x2b3   :  { %v1858_v31 = vrot.slane %v1857_v10, 2 }
 0x2b5   :  { %v1859_v26 = vadd.f32 %v1858_v31, %v1857_v10 }
 0x2b7   :  { %v1860_v5 = vrot.slane %v1859_v26, 1 }
 0x2b9   :  { %v1861_v34 = vadd.f32 %v1860_v5, %v1859_v26 }
 0x2bb   :  { %v2380_v25 = vsel %vm2047_vm1, %v1861_v34, %v1974_v27 }
 0x2bc   :  { %v2382_v8 = vsel %vm2381_vm5, %v2380_v25, %v2379_v24 }
 0x2bd   :  { %2385 = vperm.xlu0 %2657, %v2382_v8  }
 0x338   :  { %v2386_v35 = vpop.permute.xlu0 %2385 }
 0x339   :  { %2388 = vst [vmem:[%s3300_s4] sm:$0x7] %v2386_v35 }
 0x33a   :  { %2393 = vsyncpa [#allocation3], 1 }
 0x33b   :  { %2394 = vsyncpa [#allocation5], 1 }

</bundles_post_ra>
